<compile_context>
chip_gen: v7x
topology: tpu7x:2x2x1
jax: 0.10.0
libtpu: 0.0.40
codegen_flags: <defaults>
</compile_context>

<pallas_src>
import jax
import jax.numpy as jnp
from jax.experimental import pallas as pl
from jax.experimental.pallas import tpu as pltpu

# ----------------------------- configuration --------------------------------
HIDDEN = 768        # fixed by the module: Linear(768, vocab_size)
VOCAB = 256         # vocab_size (global in the reference script) - kept small
BATCH = 2
SEQ = 8
N_STUB_LAYERS = 2   # depth of the deterministic gpt stand-in


# --------------------- fused backbone + head Pallas kernel -------------------
def _fused_backbone_head_kernel(h0_ref, wl_ref, wp_ref, b_ref, o_ref, h_scr):
    """Grid axis 0 = GPT-stub layer index (sequential, 'arbitrary').

    Step l:
        h <- h0                        (only on l == 0; h stays resident in VMEM)
        h <- tanh(bf16(h) @ W_l) + h   (residual add kept in f32)
    Last step additionally:
        logits <- bf16(h) @ W_proj + b (lane-dense 256-wide f32 store)

    All matmuls take bf16 operands and accumulate in f32 on the MXU.
    """
    l = pl.program_id(0)
    n_layers = pl.num_programs(0)

    @pl.when(l == 0)
    def _():
        h_scr[...] = h0_ref[...]

    h = h_scr[...]                                            # (M, D) f32
    z = jnp.tanh(
        jnp.dot(h.astype(jnp.bfloat16), wl_ref[0],
                preferred_element_type=jnp.float32)
    ) + h                                                     # f32 residual
    h_scr[...] = z

    @pl.when(l == n_layers - 1)
    def _():
        logits = jnp.dot(z.astype(jnp.bfloat16), wp_ref[...],
                         preferred_element_type=jnp.float32)  # (M, V) f32
        o_ref[...] = logits + b_ref[...]


@jax.jit
def pallas_backbone_and_head(h0, w_layers, w_proj, b):
    """h0: (M, 768) f32 embedding output; w_layers: (L, 768, 768) bf16;
    w_proj: (768, V) bf16 (PyTorch Linear weight transposed); b: (V,) f32.
    Returns (M, V) f32 logits."""
    M, D = h0.shape
    L = w_layers.shape[0]
    V = w_proj.shape[1]

    return pl.pallas_call(
        _fused_backbone_head_kernel,
        out_shape=jax.ShapeDtypeStruct((M, V), jnp.float32),
        grid=(L,),
        in_specs=[
            pl.BlockSpec((M, D), lambda l: (0, 0)),        # fetched once, reused
            pl.BlockSpec((1, D, D), lambda l: (l, 0, 0)),  # per-layer weight DMA
            pl.BlockSpec((D, V), lambda l: (0, 0)),        # fetched once
            pl.BlockSpec((1, V), lambda l: (0, 0)),        # bias, f32
        ],
        out_specs=pl.BlockSpec((M, V), lambda l: (0, 0)),  # written on last step
        scratch_shapes=[pltpu.VMEM((M, D), jnp.float32)],  # resident activation
        compiler_params=pltpu.CompilerParams(
            dimension_semantics=("arbitrary",),            # layers are sequential
        ),
    )(h0, w_layers, w_proj, b.reshape(1, V))


# ------------------------ deterministic GPT stand-in -------------------------
def embed(params, x):
    S = x.shape[1]
    return params["wte"][x] + params["wpe"][jnp.arange(S)][None, :, :]


# ------------------------------ ChatbotModel ---------------------------------
def init_params(key):
    k_wte, k_wpe, k_layers, k_w, k_b = jax.random.split(key, 5)
    wte = jax.random.normal(k_wte, (VOCAB, HIDDEN), jnp.float32) * 0.02
    wpe = jax.random.normal(k_wpe, (SEQ, HIDDEN), jnp.float32) * 0.02
    # Weights stored bf16 at init (per perf review): halves weight DMA, removes
    # per-call convert ops. bf16-rounded values ARE the module's parameters.
    layers = (jax.random.normal(
        k_layers, (N_STUB_LAYERS, HIDDEN, HIDDEN), jnp.float32) * 0.02
    ).astype(jnp.bfloat16)
    # PyTorch Linear(768, vocab): weight (vocab, 768), bias (vocab,)
    w_torch = jax.random.normal(k_w, (VOCAB, HIDDEN), jnp.float32) * 0.02
    b = jax.random.normal(k_b, (VOCAB,), jnp.float32) * 0.02
    return {
        "wte": wte,
        "wpe": wpe,
        "layers": layers,                       # (L, D, D) bf16
        "w": w_torch.T.astype(jnp.bfloat16),    # stored as (D, V) bf16
        "b": b,                                 # (V,) f32
    }


def chatbot_forward(params, x):
    """x: (B, S) int32 token ids -> logits (B, S, VOCAB)."""
    B, S = x.shape
    h0 = embed(params, x).reshape(B * S, HIDDEN)          # (M, 768) f32
    logits = pallas_backbone_and_head(
        h0, params["layers"], params["w"], params["b"])
    return logits.reshape(B, S, VOCAB)


# ------------------------------- references ----------------------------------
def reference_forward(params, x, *, bf16_matmuls):
    """Plain-JAX reference.  bf16_matmuls=True mirrors the kernel's MXU operand
    precision exactly; False uses full-f32 matmuls on the same (bf16-stored)
    parameter values."""
    B, S = x.shape
    h = embed(params, x).reshape(B * S, HIDDEN)           # f32
    op_dtype = jnp.bfloat16 if bf16_matmuls else jnp.float32
    for l in range(N_STUB_LAYERS):
        wl = params["layers"][l].astype(op_dtype)
        h = jnp.tanh(jnp.dot(h.astype(op_dtype), wl,
                             preferred_element_type=jnp.float32)) + h
    logits = jnp.dot(h.astype(op_dtype), params["w"].astype(op_dtype),
                     preferred_element_type=jnp.float32) + params["b"]
    return logits.reshape(B, S, VOCAB)


# ----------------------------------- main ------------------------------------
if __name__ == "__main__":
    key = jax.random.PRNGKey(0)
    k_params, k_tokens = jax.random.split(key)

    params = init_params(k_params)
    x = jax.random.randint(k_tokens, (BATCH, SEQ), 0, VOCAB, dtype=jnp.int32)

    logits = jax.block_until_ready(chatbot_forward(params, x))
    assert logits.shape == (BATCH, SEQ, VOCAB)
    assert bool(jnp.isfinite(logits).all())

    # Reference 1: mirrors the kernel's bf16-operand / f32-accumulate matmuls.
    ref_bf = reference_forward(params, x, bf16_matmuls=True)
    assert jnp.allclose(logits, ref_bf, atol=1e-3, rtol=1e-2)

    # Reference 2: full-f32 matmuls on the same parameters (f32 residual in the
    # kernel lets this tolerance be much tighter than before).
    ref_f32 = reference_forward(params, x, bf16_matmuls=False)
    assert jnp.allclose(logits, ref_f32, atol=5e-3, rtol=5e-2)

    print("KERNEL_OK")
</pallas_src>

<mosaic_0001>
module attributes {stable_mosaic.version = 11 : i64} {
  func.func @_fused_backbone_head_kernel(%arg0: i32, %arg1: memref<16x768xf32, #tpu.memory_space<vmem>>, %arg2: memref<1x768x768xbf16, #tpu.memory_space<vmem>>, %arg3: memref<768x256xbf16, #tpu.memory_space<vmem>>, %arg4: memref<1x256xf32, #tpu.memory_space<vmem>>, %arg5: memref<16x256xf32, #tpu.memory_space<vmem>>, %arg6: memref<16x768xf32, #tpu.memory_space<vmem>>) attributes {dimension_semantics = [#tpu.dimension_semantics<arbitrary>], iteration_bounds = array<i64: 2>, scalar_prefetch = 0 : i64, scratch_operands = 1 : i64, tpu.core_type = #tpu.core_type<tc>, window_params = [{pipeline_mode = #tpu.pipeline_mode<synchronous>, transform_indices = @transform_0, window_bounds = array<i64: 16, 768>}, {transform_indices = @transform_1, window_bounds = array<i64: 1, 768, 768>}, {pipeline_mode = #tpu.pipeline_mode<synchronous>, transform_indices = @transform_2, window_bounds = array<i64: 768, 256>}, {pipeline_mode = #tpu.pipeline_mode<synchronous>, transform_indices = @transform_3, window_bounds = array<i64: 1, 256>}, {pipeline_mode = #tpu.pipeline_mode<synchronous>, transform_indices = @transform_4, window_bounds = array<i64: 16, 256>}]} {
    %c0_i32 = arith.constant 0 : i32
    %0 = arith.cmpi eq, %arg0, %c0_i32 : i32
    %1 = arith.extui %0 : i1 to i32
    %c0_i32_0 = arith.constant 0 : i32
    %2 = arith.cmpi ne, %1, %c0_i32_0 : i32
    scf.if %2 {
      %c0_8 = arith.constant 0 : index
      %c0_9 = arith.constant 0 : index
      %14 = vector.load %arg1[%c0_8, %c0_9] : memref<16x768xf32, #tpu.memory_space<vmem>>, vector<16x768xf32>
      %c0_10 = arith.constant 0 : index
      %c0_11 = arith.constant 0 : index
      %15 = vector.load %arg6[%c0_10, %c0_11] : memref<16x768xf32, #tpu.memory_space<vmem>>, vector<16x768xf32>
      tpu.vector_store %arg6[%c0_10, %c0_11], %14 {strides = array<i32>} : memref<16x768xf32, #tpu.memory_space<vmem>>, vector<16x768xf32>,
    } else {
    }
    %c0 = arith.constant 0 : index
    %c0_1 = arith.constant 0 : index
    %3 = vector.load %arg6[%c0, %c0_1] : memref<16x768xf32, #tpu.memory_space<vmem>>, vector<16x768xf32>
    %4 = arith.truncf %3 : vector<16x768xf32> to vector<16x768xbf16>
    %c0_2 = arith.constant 0 : index
    %c0_3 = arith.constant 0 : index
    %c0_4 = arith.constant 0 : index
    %5 = vector.load %arg2[%c0_2, %c0_3, %c0_4] : memref<1x768x768xbf16, #tpu.memory_space<vmem>>, vector<1x768x768xbf16>
    %6 = vector.shape_cast %5 : vector<1x768x768xbf16> to vector<768x768xbf16>
    %cst = arith.constant dense<0.000000e+00> : vector<16x768xf32>
    %7 = tpu.matmul %4, %6, %cst {dimension_numbers = #tpu.dot_dimension_numbers<[1], [0], [0], [1], [0, 0, 1, 1], [], []>} : vector<16x768xbf16>, vector<768x768xbf16>, vector<16x768xf32> -> vector<16x768xf32>
    %8 = math.tanh %7 : vector<16x768xf32>
    %9 = arith.addf %8, %3 : vector<16x768xf32>
    %c0_5 = arith.constant 0 : index
    %c0_6 = arith.constant 0 : index
    %10 = vector.load %arg6[%c0_5, %c0_6] : memref<16x768xf32, #tpu.memory_space<vmem>>, vector<16x768xf32>
    tpu.vector_store %arg6[%c0_5, %c0_6], %9 {strides = array<i32>} : memref<16x768xf32, #tpu.memory_space<vmem>>, vector<16x768xf32>,
    %c1_i32 = arith.constant 1 : i32
    %11 = arith.cmpi eq, %arg0, %c1_i32 : i32
    %12 = arith.extui %11 : i1 to i32
    %c0_i32_7 = arith.constant 0 : i32
    %13 = arith.cmpi ne, %12, %c0_i32_7 : i32
    scf.if %13 {
      %14 = arith.truncf %9 : vector<16x768xf32> to vector<16x768xbf16>
      %c0_8 = arith.constant 0 : index
      %c0_9 = arith.constant 0 : index
      %15 = vector.load %arg3[%c0_8, %c0_9] : memref<768x256xbf16, #tpu.memory_space<vmem>>, vector<768x256xbf16>
      %cst_10 = arith.constant dense<0.000000e+00> : vector<16x256xf32>
      %16 = tpu.matmul %14, %15, %cst_10 {dimension_numbers = #tpu.dot_dimension_numbers<[1], [0], [0], [1], [0, 0, 1, 1], [], []>} : vector<16x768xbf16>, vector<768x256xbf16>, vector<16x256xf32> -> vector<16x256xf32>
      %c0_11 = arith.constant 0 : index
      %c0_12 = arith.constant 0 : index
      %17 = vector.load %arg4[%c0_11, %c0_12] : memref<1x256xf32, #tpu.memory_space<vmem>>, vector<1x256xf32>
      %18 = vector.broadcast %17 : vector<1x256xf32> to vector<16x256xf32>
      %19 = arith.addf %16, %18 : vector<16x256xf32>
      %c0_13 = arith.constant 0 : index
      %c0_14 = arith.constant 0 : index
      %20 = vector.load %arg5[%c0_13, %c0_14] : memref<16x256xf32, #tpu.memory_space<vmem>>, vector<16x256xf32>
      tpu.vector_store %arg5[%c0_13, %c0_14], %19 {strides = array<i32>} : memref<16x256xf32, #tpu.memory_space<vmem>>, vector<16x256xf32>,
    } else {
    }
    return
  }
  func.func @transform_0(%arg0: i32) -> (i32, i32) {
    %c0_i32 = arith.constant 0 : i32
    %c0_i32_0 = arith.constant 0 : i32
    %c0_i32_1 = arith.constant 0 : i32
    return %c0_i32, %c0_i32_0 : i32, i32
  }
  func.func @transform_1(%arg0: i32) -> (i32, i32, i32) {
    %c0_i32 = arith.constant 0 : i32
    %c0_i32_0 = arith.constant 0 : i32
    %c0_i32_1 = arith.constant 0 : i32
    return %arg0, %c0_i32, %c0_i32_0 : i32, i32, i32
  }
  func.func @transform_2(%arg0: i32) -> (i32, i32) {
    %c0_i32 = arith.constant 0 : i32
    %c0_i32_0 = arith.constant 0 : i32
    %c0_i32_1 = arith.constant 0 : i32
    return %c0_i32, %c0_i32_0 : i32, i32
  }
  func.func @transform_3(%arg0: i32) -> (i32, i32) {
    %c0_i32 = arith.constant 0 : i32
    %c0_i32_0 = arith.constant 0 : i32
    %c0_i32_1 = arith.constant 0 : i32
    return %c0_i32, %c0_i32_0 : i32, i32
  }
  func.func @transform_4(%arg0: i32) -> (i32, i32) {
    %c0_i32 = arith.constant 0 : i32
    %c0_i32_0 = arith.constant 0 : i32
    %c0_i32_1 = arith.constant 0 : i32
    return %c0_i32, %c0_i32_0 : i32, i32
  }
}

</mosaic_0001>

<bundles_post_ra>
// kernel: pallas_backbone_and_head.1
= control target key start
LH: loop header
LB: loop body
LE: loop exit
PB: predicated region body
PF: predicated region fallthrough
CT: control target
= control target key end

     0   :  { %s5214_s0 = inlined_call_operand.hbm [shape: f32[16,768], index: 0, kind: input, shape index: {}]   ;;  %s5215_s1 = inlined_call_operand.hbm [shape: bf16[2,768,768], index: 1, kind: input, shape index: {}]   ;;  %s5216_s2 = inlined_call_operand.hbm [shape: bf16[768,256], index: 2, kind: input, shape index: {}]   ;;  %s5217_s3 = inlined_call_operand.hbm [shape: f32[1,256], index: 3, kind: input, shape index: {}]   ;;  %s5218_s4 = inlined_call_operand.hbm [shape: f32[16,256], index: 4, kind: output, shape index: {}]  }
   0x1   :  { %5223 = sst [smem:[#allocation17_spill]] %s5216_s2 }
   0x2   :  { %9 = vsyncpa [#allocation4], 0 }
   0x3   :  { %10 = vsyncpa [#allocation7], 0 }
   0x4   :  { %12 = vsyncpa [#allocation7 + $0x1], 0 }
   0x5   :  { %13 = vsyncpa [#allocation10], 0 }
   0x6   :  { %14 = vsyncpa [#allocation5], 0  ;;  %s4630_s15 = smov 0   ;;  %s4632_s16 = smov 0  }
   0x7   :  { %s4634_s17 = smov 0   ;;  %s4636_s18 = smov 0  }
   0x8 LB: > { %s4649_s19 = sadd.s32 4294967295, %s4590_s18   ;;  %s4652_s20 = sadd.s32 1, %s4590_s18   ;;  %s4590_s18 = sphi %s4636_s18, %s5244_s18   ;;  %s4586_s17 = sphi %s4634_s17, %s5243_s17   ;;  %s4582_s16 = sphi %s4632_s16, %s5242_s16   ;;  %s4578_s15 = sphi %s4630_s15, %s5241_s15  }
   0x9   : > { %s45_s21 = ssub.s32 %s4590_s18, %s4652_s20  ;;  %s48_s22 = sadd.s32 1, %s4586_s17 }
   0xa   : > { %p46_p0 = scmp.eq.s32.totalorder %s45_s21, 0  ;;  %p55_p1 = scmp.ne.s32.totalorder %s4586_s17, %s4582_s16 }
   0xb   : > { %p56_p2 = scmp.eq.s32.totalorder %s4590_s18, 0  ;;  %p61_p3 = scmp.ne.s32.totalorder %s4582_s16, %s4578_s15 }
   0xc   : > { %s4662_s23 = scalar_select %p46_p0, %s4586_s17, %s48_s22  }
   0xd   : > { %p4664_p4 = por %p56_p2, %p55_p1  ;;  %p5219_p5 = scmp.eq.s32.totalorder %s4649_s19, 0 }
   0xe   : > { %p3265_p6 = scmp.ge.s32.totalorder %s4590_s18, 1  ;;  %p135_p7 = scmp.lt.s32.totalorder %s4590_s18, 3 }
   0xf   : > { %p4673_p8 = por %p5219_p5, %p61_p3  ;;  %s4592_s27 = smov [#allocation8]  }
  0x10   : > { %p4678_p10 = pnand %p3265_p6, %p135_p7  ;;  %s160_s28 = sshll.u32 %s4592_s27, 4  ;;  %s161_s28 = int_to_ptr.vmem [resolvable:$true] %s160_s28 }
  0x11   : > { %s5225_s25 = scalar_select %p4673_p8, 1, 0 }
  0x12   : > { %s5226_s26 = scalar_select %p4678_p10, 1, 0 }
  0x13   : > { %p3722_p11 = pneg %p4678_p10  ;;  %p3739_p13 = scmp.lt.s32.totalorder %s4590_s18, 2 }
  0x14   : > { %s5229_s2 = sld [smem:[#allocation17_spill]] }
  0x15   : > { %p4686_p12 = pnand %p3722_p11, %p5219_p5  ;;  %p4693_p0 = pnand %p3739_p13, %p4664_p4 }
  0x17   : > { %s5228_s30 = scalar_select %p4693_p0, 1, 0 }
  0x18   : > { %p4705_p2 = pneg %p4686_p12 }
  0x1a   : > { %s4400_s7 = scalar_lea.hbm %s5229_s2, 12288 }
  0x1b   : > { %p4401_p1 = scmp.ne.s32.totalorder %s5229_s2, %s4400_s7  ;;  %p4407_p6 = scmp.lt.u32.totalorder %s4400_s7, %s5229_s2 }
  0x1d   : > { %p4403_p3 = pnand %p4705_p2, %p4401_p1 }
  0x1f   : > { %p4404_p4 = pneg %p4403_p3 }
  0x21   : > { %p4409_p7 = pnand %p4407_p6, %p4404_p4 }
  0x23   : > { %4412 = shalt.err (!%p4409_p7)
}
  0x24   : > { %s4413_s13 = scalar_lea.vmem %s161_s28, 12288  ;;  %p4421_p5 = scmp.lt.s32.totalorder %s161_s28, %s161_s28 }
  0x25   : > { %p4414_p11 = scmp.ne.s32.totalorder %s161_s28, %s4413_s13  ;;  %p4422_p8 = scmp.lt.s32.totalorder %s4413_s13, %s4413_s13 }
  0x27   : > { %p4416_p13 = pnand %p4414_p11, %p4705_p2  ;;  %p4423_p10 = por %p4422_p8, %p4421_p5 }
  0x29   : > { %p4417_p9 = pneg %p4416_p13 }
  0x2b   : > { %p4424_p0 = pnand %p4423_p10, %p4417_p9 }
  0x2d   : > { %4427 = shalt.err (!%p4424_p0)
}
  0x2e   : > { %s4593_s14 = smov 128   ;;  %s4594_s15 = smov 8  }
  0x2f   : > { %3728 = dma.hbm_to_vmem [thread:$0]  (!%p4686_p12), %s5229_s2, 12288, %s161_s28, [#allocation7], %s4593_s14, %s4593_s14, %s4594_s15  }
  0x30   : > { %s4595_s24 = smov [#allocation3]   ;;  %s4428_s7 = scalar_lea.hbm %s5214_s0, 1536 }
  0x31   : > { %s147_s27 = sshll.u32 %s4595_s24, 4  ;;  %p4429_p5 = scmp.ne.s32.totalorder %s5214_s0, %s4428_s7  ;;  %s148_s27 = int_to_ptr.vmem [resolvable:$true] %s147_s27 }
  0x32   : > { %p4435_p10 = scmp.lt.u32.totalorder %s4428_s7, %s5214_s0 }
  0x33   : > { %p4431_p8 = pnand %p4429_p5, %p4705_p2 }
  0x35   : > { %p4432_p9 = pneg %p4431_p8 }
  0x37   : > { %p4437_p0 = pnand %p4435_p10, %p4432_p9 }
  0x39   : > { %4440 = shalt.err (!%p4437_p0)
}
  0x3a   : > { %s4441_s28 = scalar_lea.vmem %s148_s27, 1536  ;;  %p4449_p6 = scmp.lt.s32.totalorder %s148_s27, %s148_s27 }
  0x3b   : > { %p4442_p1 = scmp.ne.s32.totalorder %s148_s27, %s4441_s28  ;;  %p4450_p7 = scmp.lt.s32.totalorder %s4441_s28, %s4441_s28 }
  0x3d   : > { %p4444_p3 = pnand %p4442_p1, %p4705_p2  ;;  %p4451_p11 = por %p4450_p7, %p4449_p6 }
  0x3f   : > { %p4445_p4 = pneg %p4444_p3 }
  0x41   : > { %p4452_p13 = pnand %p4451_p11, %p4445_p4 }
  0x43   : > { %4455 = shalt.err (!%p4452_p13)
}
  0x44   : > { %s4596_s13 = smov 768   ;;  %s4597_s14 = smov 48  }
  0x45   : > { %3725 = dma.hbm_to_vmem [thread:$0]  (!%p4686_p12), %s5214_s0, 1536, %s148_s27, [#allocation4], %s4596_s13, %s4596_s13, %s4597_s14  }
  0x46   : > { %s4598_s22 = smov [#allocation9]   ;;  %s185_s5 = sand.u32 1, %s4590_s18  }
  0x47   : > { %s174_s24 = sshll.u32 %s4598_s22, 4  ;;  %s187_s6 = sand.u32 1, %s4586_s17   ;;  %s175_s24 = int_to_ptr.vmem [resolvable:$true] %s174_s24 }
  0x48   : > { %s4456_s9 = scalar_lea.hbm %s5217_s3, 32 }
  0x49   : > { %p4457_p5 = scmp.ne.s32.totalorder %s5217_s3, %s4456_s9  ;;  %p4463_p10 = scmp.lt.u32.totalorder %s4456_s9, %s5217_s3 }
  0x4b   : > { %p4459_p8 = pnand %p4457_p5, %p4705_p2 }
  0x4d   : > { %p4460_p9 = pneg %p4459_p8 }
  0x4f   : > { %p4465_p0 = pnand %p4463_p10, %p4460_p9 }
  0x51   : > { %4468 = shalt.err (!%p4465_p0)
}
  0x52   : > { %s4469_s27 = scalar_lea.vmem %s175_s24, 32  ;;  %p4477_p6 = scmp.lt.s32.totalorder %s175_s24, %s175_s24 }
  0x53   : > { %p4470_p1 = scmp.ne.s32.totalorder %s175_s24, %s4469_s27  ;;  %p4478_p7 = scmp.lt.s32.totalorder %s4469_s27, %s4469_s27 }
  0x55   : > { %p4472_p3 = pnand %p4470_p1, %p4705_p2  ;;  %p4479_p11 = por %p4478_p7, %p4477_p6 }
  0x57   : > { %p4473_p4 = pneg %p4472_p3 }
  0x59   : > { %p4480_p13 = pnand %p4479_p11, %p4473_p4 }
  0x5b   : > { %4483 = shalt.err (!%p4480_p13)
}
  0x5c   : > { %3731 = dma.hbm_to_vmem [thread:$0]  (!%p4686_p12), %s5217_s3, 32, %s175_s24, [#allocation10]  }
  0x5d   : > { %s3701_s2 = smul.u32 2304, %s187_s6  ;;  %s4767_s8 = scalar_lea.sflag [#allocation7], %s185_s5 }
  0x5e   : > { %s3702_s15 = smul.u32 36864, %s4590_s18  ;;  %p5231_p12 = scmp.ne.s32.totalorder %s5228_s30, 0 }
  0x5f   : > { %s189_s7 = scalar_lea.vmem [#allocation6], %s3701_s2  ;;  %s4489_s6 = scalar_lea.hbm %s5215_s1, 73728 }
  0x60   : > { %s4763_s22 = scalar_lea.hbm %s5215_s1, %s3702_s15  ;;  %s196_s29 = sshll.u32 %s189_s7, 4  ;;  %s4765_s29 = int_to_ptr.vmem [resolvable:$true] %s196_s29 }
  0x61   : > { %s4484_s9 = scalar_lea.hbm %s4763_s22, 36864  ;;  %p4486_p5 = pneg %p5231_p12 }
  0x62   : > { %p4485_p2 = scmp.ne.s32.totalorder %s4763_s22, %s4484_s9  ;;  %p4490_p10 = scmp.lt.u32.totalorder %s4763_s22, %s5215_s1 }
  0x63   : > { %p4491_p0 = scmp.lt.u32.totalorder %s4489_s6, %s4484_s9  ;;  %p4493_p3 = scmp.lt.u32.totalorder %s4484_s9, %s4763_s22 }
  0x64   : > { %p4487_p8 = pnand %p4486_p5, %p4485_p2 }
  0x65   : > { %p4492_p1 = por %p4491_p0, %p4490_p10 }
  0x66   : > { %p4488_p9 = pneg %p4487_p8 }
  0x67   : > { %p4494_p4 = por %p4493_p3, %p4492_p1 }
  0x69   : > { %p4495_p6 = pnand %p4494_p4, %p4488_p9 }
  0x6b   : > { %4498 = shalt.err (!%p4495_p6)
}
  0x6c   : > { %s4499_s5 = scalar_lea.vmem %s4765_s29, 36864  ;;  %s4599_s28 = smov [#allocation6]  }
  0x6d   : > { %p4500_p7 = scmp.ne.s32.totalorder %s4765_s29, %s4499_s5  ;;  %s4504_s27 = sshll.u32 %s4599_s28, 4  ;;  %s4505_s27 = int_to_ptr.vmem [resolvable:$false] %s4504_s27 }
  0x6e   : > { %s4506_s13 = scalar_lea.vmem %s4505_s27, 73728  ;;  %p4507_p2 = scmp.lt.s32.totalorder %s4765_s29, %s4505_s27 }
  0x6f   : > { %p4502_p11 = pnand %p4500_p7, %p4486_p5  ;;  %p4508_p8 = scmp.lt.s32.totalorder %s4506_s13, %s4499_s5 }
  0x71   : > { %p4503_p13 = pneg %p4502_p11  ;;  %p4509_p10 = por %p4508_p8, %p4507_p2 }
  0x73   : > { %p4510_p0 = pnand %p4509_p10, %p4503_p13 }
  0x75   : > { %4513 = shalt.err (!%p4510_p0)
}
  0x76   : > { %s4600_s14 = smov 384   ;;  %s4601_s2 = smov 24  }
  0x77   : > { %3735 = dma.hbm_to_vmem [thread:$0]  (!%p5231_p12), %s4763_s22, 36864, %s4765_s29, %s4767_s8, %s4600_s14, %s4600_s14, %s4601_s2  }
  0x78   : > { %p5232_p5 = scmp.ne.s32.totalorder %s5226_s26, 0 }
  0x79   : > { %p5233_p9 = scmp.eq.s32.totalorder (!%p5232_p5), %s4649_s19, 0 }
  0x7a   : > { %208 = sbr.rel (%p5232_p5) target bundleno = 1068 (0x42c), region = 36 }
  0x81   : > { %4557 = dma.done.wait (%p5233_p9), [#allocation4], 1536   ;;  %p5234_p1 = pmov %p5233_p9 }
  0x82   : > { %s214_s15 = sand.u32 1, %s4649_s19   ;;  %s216_s21 = sand.u32 1, %s4582_s16  }
  0x83   : > { %4559 = vsyncadd (%p5234_p1), [#allocation4], 4294965760  ;;  %s3703_s10 = smul.u32 2304, %s216_s21  ;;  %s215_s7 = scalar_lea.sflag [#allocation7], %s214_s15 }
  0x84   : > { %p5235_p3 = scmp.ne.s32.totalorder %s5225_s25, 0 }
  0x85   : > { %s4803_s9 = scalar_lea.vmem [#allocation6], %s3703_s10 }
  0x86   : > { %4561 = dma.done.wait (%p5235_p3), %s215_s7, 36864  }
  0x87   : > { %4563 = vsyncadd (%p5235_p3), %s215_s7, 4294930432  ;;  %p5236_p12 = pmov %p5234_p1 }
  0x88   : > { %p5237_p4 = pmov %p5234_p1 }
  0x89   : > { %4565 = dma.done.wait (%p5236_p12), [#allocation7], 12288  }
  0x8a   : > { %4567 = vsyncadd (%p5237_p4), [#allocation7], 4294955008  ;;  %p5238_p6 = pmov %p5234_p1 }
  0x8b   : > { %p5239_p7 = pmov %p5234_p1 }
  0x8c   : > { %4569 = dma.done.wait (%p5238_p6), [#allocation10], 32  }
  0x8d   : > { %4571 = vsyncadd (%p5239_p7), [#allocation10], 4294967264  ;;  %p5240_p11 = scmp.ne.s32.totalorder %s4649_s19, 0 }
  0x8e   : > { %v250_v0 = vld [vmem:[#allocation3] sm:$0xff] (!%p5240_p11)  ;;  %v251_v1 = vld [vmem:[#allocation3 + $0x8] sm:$0xff] (!%p5240_p11)  ;;  %v252_v2 = vld [vmem:[#allocation3 + $0x10] sm:$0xff] (!%p5240_p11) }
  0x8f   : > { %249 = sbr.rel (%p5240_p11) target bundleno = 150 (0x96), region = 56  ;;  %262 = vst [vmem:[#allocation2] sm:$0xff] (!%p5240_p11), %v250_v0  ;;  %263 = vst [vmem:[#allocation2 + $0x8] sm:$0xff] (!%p5240_p11), %v251_v1  ;;  %v253_v3 = vld [vmem:[#allocation3 + $0x18] sm:$0xff] (!%p5240_p11)  ;;  %v254_v4 = vld [vmem:[#allocation3 + $0x20] sm:$0xff] (!%p5240_p11) }
  0x90   : > { %264 = vst [vmem:[#allocation2 + $0x10] sm:$0xff] (!%p5240_p11), %v252_v2  ;;  %v255_v5 = vld [vmem:[#allocation3 + $0x28] sm:$0xff] (!%p5240_p11)  ;;  %265 = vst [vmem:[#allocation2 + $0x18] sm:$0xff] (!%p5240_p11), %v253_v3  ;;  %v256_v6 = vld [vmem:[#allocation3 + $0x30] sm:$0xff] (!%p5240_p11) }
  0x91   : > { %266 = vst [vmem:[#allocation2 + $0x20] sm:$0xff] (!%p5240_p11), %v254_v4  ;;  %267 = vst [vmem:[#allocation2 + $0x28] sm:$0xff] (!%p5240_p11), %v255_v5  ;;  %v257_v7 = vld [vmem:[#allocation3 + $0x38] sm:$0xff] (!%p5240_p11)  ;;  %v258_v8 = vld [vmem:[#allocation3 + $0x40] sm:$0xff] (!%p5240_p11) }
  0x92   : > { %268 = vst [vmem:[#allocation2 + $0x30] sm:$0xff] (!%p5240_p11), %v256_v6  ;;  %269 = vst [vmem:[#allocation2 + $0x38] sm:$0xff] (!%p5240_p11), %v257_v7  ;;  %v259_v9 = vld [vmem:[#allocation3 + $0x48] sm:$0xff] (!%p5240_p11)  ;;  %v260_v10 = vld [vmem:[#allocation3 + $0x50] sm:$0xff] (!%p5240_p11) }
  0x93   : > { %270 = vst [vmem:[#allocation2 + $0x40] sm:$0xff] (!%p5240_p11), %v258_v8  ;;  %v261_v11 = vld [vmem:[#allocation3 + $0x58] sm:$0xff] (!%p5240_p11)  ;;  %271 = vst [vmem:[#allocation2 + $0x48] sm:$0xff] (!%p5240_p11), %v259_v9 }
  0x94   : > { %272 = vst [vmem:[#allocation2 + $0x50] sm:$0xff] (!%p5240_p11), %v260_v10  ;;  %273 = vst [vmem:[#allocation2 + $0x58] sm:$0xff] (!%p5240_p11), %v261_v11 }
  0x96 PF: > { %v3789_v12 = vld [vmem:[%s4803_s9 + $0x4] ss:$24 sps:$4 sm:$0xff]   ;;  %v3793_v14 = vld [vmem:[%s4803_s9] ss:$24 sps:$4 sm:$0xff]   ;;  %v3795_v16 = vld [vmem:[%s4803_s9 + $0x34] ss:$24 sps:$4 sm:$0xff]  }
  0x97   : > { %v3791_v13 = vld [vmem:[%s4803_s9 + $0x304] ss:$24 sps:$4 sm:$0xff]   ;;  %2020 = vmatprep.subr.bf16.mxu1 %v3789_v12  ;;  %v3794_v15 = vld [vmem:[%s4803_s9 + $0x300] ss:$24 sps:$4 sm:$0xff]   ;;  %v3797_v17 = vld [vmem:[%s4803_s9 + $0x334] ss:$24 sps:$4 sm:$0xff]  }
  0x98   : > { %2063 = vmatprep.subr.bf16.mxu0 %v3791_v13  ;;  %2021 = vmatpush1.bf16.msra.mxu1 %v3793_v14  ;;  %v3799_v18 = vld [vmem:[%s4803_s9 + $0x30] ss:$24 sps:$4 sm:$0xff]   ;;  %v3801_v20 = vld [vmem:[%s4803_s9 + $0x64] ss:$24 sps:$4 sm:$0xff]   ;;  %v3805_v22 = vld [vmem:[%s4803_s9 + $0x60] ss:$24 sps:$4 sm:$0xff]  }
  0x99   : > { %2064 = vmatpush1.bf16.msra.mxu0 %v3794_v15  ;;  %2022 = vmatprep.subr.bf16.mxu1 %v3795_v16  ;;  %v3800_v19 = vld [vmem:[%s4803_s9 + $0x330] ss:$24 sps:$4 sm:$0xff]   ;;  %v3803_v21 = vld [vmem:[%s4803_s9 + $0x364] ss:$24 sps:$4 sm:$0xff]   ;;  %v3806_v23 = vld [vmem:[%s4803_s9 + $0x360] ss:$24 sps:$4 sm:$0xff]  }
  0x9a   : > { %2065 = vmatprep.subr.bf16.mxu0 %v3797_v17  ;;  %v3807_v24 = vld [vmem:[%s4803_s9 + $0x94] ss:$24 sps:$4 sm:$0xff]   ;;  %v3811_v26 = vld [vmem:[%s4803_s9 + $0x90] ss:$24 sps:$4 sm:$0xff]   ;;  %v3813_v28 = vld [vmem:[%s4803_s9 + $0xc4] ss:$24 sps:$4 sm:$0xff]  }
  0x9b   : > { %v3809_v25 = vld [vmem:[%s4803_s9 + $0x394] ss:$24 sps:$4 sm:$0xff]   ;;  %v3812_v27 = vld [vmem:[%s4803_s9 + $0x390] ss:$24 sps:$4 sm:$0xff]   ;;  %v3815_v29 = vld [vmem:[%s4803_s9 + $0x3c4] ss:$24 sps:$4 sm:$0xff]  }
  0x9c   : > { %2023 = vmatpush1.bf16.msra.mxu1 %v3799_v18  ;;  %v3817_v30 = vld [vmem:[%s4803_s9 + $0xc0] ss:$24 sps:$4 sm:$0xff]   ;;  %v3819_v32 = vld [vmem:[%s4803_s9 + $0xf4] ss:$24 sps:$4 sm:$0xff]   ;;  %v3823_v34 = vld [vmem:[%s4803_s9 + $0xf0] ss:$24 sps:$4 sm:$0xff]  }
  0x9d   : > { %2066 = vmatpush1.bf16.msra.mxu0 %v3800_v19  ;;  %2024 = vmatprep.subr.bf16.mxu1 %v3801_v20  ;;  %v3818_v31 = vld [vmem:[%s4803_s9 + $0x3c0] ss:$24 sps:$4 sm:$0xff]   ;;  %v3821_v33 = vld [vmem:[%s4803_s9 + $0x3f4] ss:$24 sps:$4 sm:$0xff]   ;;  %v3824_v35 = vld [vmem:[%s4803_s9 + $0x3f0] ss:$24 sps:$4 sm:$0xff]  }
  0x9e   : > { %2067 = vmatprep.subr.bf16.mxu0 %v3803_v21  ;;  %v3825_v36 = vld [vmem:[%s4803_s9 + $0x124] ss:$24 sps:$4 sm:$0xff]   ;;  %v3829_v38 = vld [vmem:[%s4803_s9 + $0x120] ss:$24 sps:$4 sm:$0xff]   ;;  %v3831_v40 = vld [vmem:[%s4803_s9 + $0x154] ss:$24 sps:$4 sm:$0xff]  }
  0x9f   : > { %v3827_v37 = vld [vmem:[%s4803_s9 + $0x424] ss:$24 sps:$4 sm:$0xff]   ;;  %v3830_v39 = vld [vmem:[%s4803_s9 + $0x420] ss:$24 sps:$4 sm:$0xff]   ;;  %v3833_v41 = vld [vmem:[%s4803_s9 + $0x454] ss:$24 sps:$4 sm:$0xff]  }
  0xa0   : > { %2025 = vmatpush1.bf16.msra.mxu1 %v3805_v22  ;;  %v3835_v42 = vld [vmem:[%s4803_s9 + $0x150] ss:$24 sps:$4 sm:$0xff]   ;;  %v3837_v44 = vld [vmem:[%s4803_s9 + $0x184] ss:$24 sps:$4 sm:$0xff]   ;;  %v3841_v46 = vld [vmem:[%s4803_s9 + $0x180] ss:$24 sps:$4 sm:$0xff]  }
  0xa1   : > { %2068 = vmatpush1.bf16.msra.mxu0 %v3806_v23  ;;  %2026 = vmatprep.subr.bf16.mxu1 %v3807_v24  ;;  %v3836_v43 = vld [vmem:[%s4803_s9 + $0x450] ss:$24 sps:$4 sm:$0xff]   ;;  %v3839_v45 = vld [vmem:[%s4803_s9 + $0x484] ss:$24 sps:$4 sm:$0xff]   ;;  %v3842_v47 = vld [vmem:[%s4803_s9 + $0x480] ss:$24 sps:$4 sm:$0xff]  }
  0xa2   : > { %2069 = vmatprep.subr.bf16.mxu0 %v3809_v25  ;;  %v3843_v48 = vld [vmem:[%s4803_s9 + $0x1b4] ss:$24 sps:$4 sm:$0xff]   ;;  %v3847_v50 = vld [vmem:[%s4803_s9 + $0x1b0] ss:$24 sps:$4 sm:$0xff]   ;;  %v3849_v52 = vld [vmem:[%s4803_s9 + $0x1e4] ss:$24 sps:$4 sm:$0xff]  }
  0xa3   : > { %v3845_v49 = vld [vmem:[%s4803_s9 + $0x4b4] ss:$24 sps:$4 sm:$0xff]   ;;  %v3848_v51 = vld [vmem:[%s4803_s9 + $0x4b0] ss:$24 sps:$4 sm:$0xff]   ;;  %v3851_v53 = vld [vmem:[%s4803_s9 + $0x4e4] ss:$24 sps:$4 sm:$0xff]  }
  0xa4   : > { %2027 = vmatpush1.bf16.msra.mxu1 %v3811_v26  ;;  %v3853_v54 = vld [vmem:[%s4803_s9 + $0x1e0] ss:$24 sps:$4 sm:$0xff]   ;;  %v3855_v56 = vld [vmem:[%s4803_s9 + $0x214] ss:$24 sps:$4 sm:$0xff]   ;;  %v3859_v58 = vld [vmem:[%s4803_s9 + $0x210] ss:$24 sps:$4 sm:$0xff]  }
  0xa5   : > { %2070 = vmatpush1.bf16.msra.mxu0 %v3812_v27  ;;  %2028 = vmatprep.subr.bf16.mxu1 %v3813_v28  ;;  %v3854_v55 = vld [vmem:[%s4803_s9 + $0x4e0] ss:$24 sps:$4 sm:$0xff]   ;;  %v3857_v57 = vld [vmem:[%s4803_s9 + $0x514] ss:$24 sps:$4 sm:$0xff]   ;;  %v3860_v59 = vld [vmem:[%s4803_s9 + $0x510] ss:$24 sps:$4 sm:$0xff]  }
  0xa6   : > { %2071 = vmatprep.subr.bf16.mxu0 %v3815_v29  ;;  %v275_v60 = vld [vmem:[#allocation2 + $0x8] sm:$0xff]  ;;  %v281_v61 = vld [vmem:[#allocation2 + $0x38] sm:$0xff]  ;;  %v274_v18 = vld [vmem:[#allocation2] sm:$0xff]  ;;  %p3564_p13 = scmp.ne.s32.totalorder %s4649_s19, 1 }
  0xa7   : > { %v277_v62 = vld [vmem:[#allocation2 + $0x18] sm:$0xff]  ;;  %v283_v63 = vld [vmem:[#allocation2 + $0x48] sm:$0xff]  ;;  %v4868_v1 = vpack.c.bf16 %v281_v61, %v275_v60  ;;  %v280_v20 = vld [vmem:[#allocation2 + $0x30] sm:$0xff] }
  0xa8   : > { %2029 = vmatpush1.bf16.msra.mxu1 %v3817_v30  ;;  %v3861_v0 = vld [vmem:[%s4803_s9 + $0x244] ss:$24 sps:$4 sm:$0xff]   ;;  %v4870_v2 = vpack.c.bf16 %v283_v63, %v277_v62  ;;  %v3865_v4 = vld [vmem:[%s4803_s9 + $0x240] ss:$24 sps:$4 sm:$0xff]   ;;  %v3867_v6 = vld [vmem:[%s4803_s9 + $0x274] ss:$24 sps:$4 sm:$0xff]   ;;  %v4893_v26 = vpack.c.bf16 %v280_v20, %v274_v18 }
  0xa9   : > { %2072 = vmatpush1.bf16.msra.mxu0 %v3818_v31  ;;  %2030 = vmatprep.subr.bf16.mxu1 %v3819_v32  ;;  %v3863_v3 = vld [vmem:[%s4803_s9 + $0x544] ss:$24 sps:$4 sm:$0xff]   ;;  %v3866_v5 = vld [vmem:[%s4803_s9 + $0x540] ss:$24 sps:$4 sm:$0xff]   ;;  %v3869_v7 = vld [vmem:[%s4803_s9 + $0x574] ss:$24 sps:$4 sm:$0xff]  }
  0xaa   : > { %2073 = vmatprep.subr.bf16.mxu0 %v3821_v33  ;;  %2052 = vmatprep.mubr.bf16.mxu1 %v4868_v1  ;;  %v3871_v8 = vld [vmem:[%s4803_s9 + $0x270] ss:$24 sps:$4 sm:$0xff]   ;;  %v3873_v10 = vld [vmem:[%s4803_s9 + $0x2a4] ss:$24 sps:$4 sm:$0xff]   ;;  %v3877_v12 = vld [vmem:[%s4803_s9 + $0x2a0] ss:$24 sps:$4 sm:$0xff]  }
  0xab   : > { %2095 = vmatprep.mubr.bf16.mxu0 %v4870_v2  ;;  %v3872_v9 = vld [vmem:[%s4803_s9 + $0x570] ss:$24 sps:$4 sm:$0xff]   ;;  %v3875_v11 = vld [vmem:[%s4803_s9 + $0x5a4] ss:$24 sps:$4 sm:$0xff]   ;;  %v3878_v13 = vld [vmem:[%s4803_s9 + $0x5a0] ss:$24 sps:$4 sm:$0xff]  }
  0xac   : > { %2031 = vmatpush1.bf16.msra.mxu1 %v3823_v34  ;;  %v3879_v14 = vld [vmem:[%s4803_s9 + $0x2d4] ss:$24 sps:$4 sm:$0xff]   ;;  %v3883_v16 = vld [vmem:[%s4803_s9 + $0x2d0] ss:$24 sps:$4 sm:$0xff]   ;;  %v3887_v19 = vld [vmem:[%s4803_s9 + $0x604] ss:$24 sps:$4 sm:$0xff]  }
  0xad   : > { %2074 = vmatpush1.bf16.msra.mxu0 %v3824_v35  ;;  %2032 = vmatprep.subr.bf16.mxu1 %v3825_v36  ;;  %v3881_v15 = vld [vmem:[%s4803_s9 + $0x5d4] ss:$24 sps:$4 sm:$0xff]   ;;  %v3884_v17 = vld [vmem:[%s4803_s9 + $0x5d0] ss:$24 sps:$4 sm:$0xff]   ;;  %v282_v22 = vld [vmem:[#allocation2 + $0x40] sm:$0xff] }
  0xae   : > { %2075 = vmatprep.subr.bf16.mxu0 %v3827_v37  ;;  %v276_v21 = vld [vmem:[#allocation2 + $0x10] sm:$0xff]  ;;  %v3890_v23 = vld [vmem:[%s4803_s9 + $0xc] ss:$24 sps:$4 sm:$0xff]   ;;  %v3885_v24 = vld [vmem:[%s4803_s9 + $0x600] ss:$24 sps:$4 sm:$0xff]  }
  0xaf   : > { %v3888_v25 = vld [vmem:[%s4803_s9 + $0x8] ss:$24 sps:$4 sm:$0xff]   ;;  %v4895_v27 = vpack.c.bf16 %v282_v22, %v276_v21  ;;  %v3893_v28 = vld [vmem:[%s4803_s9 + $0x634] ss:$24 sps:$4 sm:$0xff]   ;;  %v3894_v31 = vld [vmem:[%s4803_s9 + $0x38] ss:$24 sps:$4 sm:$0xff]  }
  0xb0   : > { %2033 = vmatpush1.bf16.msra.mxu1 %v3829_v38  ;;  %v3896_v29 = vld [vmem:[%s4803_s9 + $0x3c] ss:$24 sps:$4 sm:$0xff]   ;;  %v3891_v30 = vld [vmem:[%s4803_s9 + $0x630] ss:$24 sps:$4 sm:$0xff]   ;;  %v3902_v33 = vld [vmem:[%s4803_s9 + $0x6c] ss:$24 sps:$4 sm:$0xff]  }
  0xb1   : > { %2076 = vmatpush1.bf16.msra.mxu0 %v3830_v39  ;;  %2034 = vmatprep.subr.bf16.mxu1 %v3831_v40  ;;  %v3899_v32 = vld [vmem:[%s4803_s9 + $0x664] ss:$24 sps:$4 sm:$0xff]   ;;  %v3897_v34 = vld [vmem:[%s4803_s9 + $0x660] ss:$24 sps:$4 sm:$0xff]   ;;  %v3905_v36 = vld [vmem:[%s4803_s9 + $0x694] ss:$24 sps:$4 sm:$0xff]  }
  0xb2   : > { %2077 = vmatprep.subr.bf16.mxu0 %v3833_v41  ;;  %v3900_v35 = vld [vmem:[%s4803_s9 + $0x68] ss:$24 sps:$4 sm:$0xff]   ;;  %v3908_v37 = vld [vmem:[%s4803_s9 + $0x9c] ss:$24 sps:$4 sm:$0xff]   ;;  %v3906_v39 = vld [vmem:[%s4803_s9 + $0x98] ss:$24 sps:$4 sm:$0xff]  }
  0xb3   : > { %v3903_v38 = vld [vmem:[%s4803_s9 + $0x690] ss:$24 sps:$4 sm:$0xff]   ;;  %v3911_v40 = vld [vmem:[%s4803_s9 + $0x6c4] ss:$24 sps:$4 sm:$0xff]   ;;  %v3933_v61 = vld [vmem:[%s4803_s9 + $0x780] ss:$24 sps:$4 sm:$0xff]  }
  0xb4   : > { %2035 = vmatpush1.bf16.msra.mxu1 %v3835_v42  ;;  %v3914_v41 = vld [vmem:[%s4803_s9 + $0xcc] ss:$24 sps:$4 sm:$0xff]   ;;  %v3909_v42 = vld [vmem:[%s4803_s9 + $0x6c0] ss:$24 sps:$4 sm:$0xff]   ;;  %v3968_v18 = vld [vmem:[%s4803_s9 + $0x27c] ss:$24 sps:$4 sm:$0xff]  }
  0xb5   : > { %2078 = vmatpush1.bf16.msra.mxu0 %v3836_v43  ;;  %2036 = vmatprep.subr.bf16.mxu1 %v3837_v44  ;;  %v3912_v43 = vld [vmem:[%s4803_s9 + $0xc8] ss:$24 sps:$4 sm:$0xff]   ;;  %v3917_v44 = vld [vmem:[%s4803_s9 + $0x6f4] ss:$24 sps:$4 sm:$0xff]   ;;  %v3966_v20 = vld [vmem:[%s4803_s9 + $0x278] ss:$24 sps:$4 sm:$0xff]  }
  0xb6   : > { %2079 = vmatprep.subr.bf16.mxu0 %v3839_v45  ;;  %v3920_v45 = vld [vmem:[%s4803_s9 + $0xfc] ss:$24 sps:$4 sm:$0xff]   ;;  %v3938_v60 = vld [vmem:[%s4803_s9 + $0x18c] ss:$24 sps:$4 sm:$0xff]   ;;  %v3936_v62 = vld [vmem:[%s4803_s9 + $0x188] ss:$24 sps:$4 sm:$0xff]  }
  0xb7   : > { %v3941_v63 = vld [vmem:[%s4803_s9 + $0x7b4] ss:$24 sps:$4 sm:$0xff]   ;;  %v3971_v21 = vld [vmem:[%s4803_s9 + $0x8a4] ss:$24 sps:$4 sm:$0xff]  }
  0xb8   : > { %2037 = vmatpush1.bf16.msra.mxu1 %v3841_v46  ;;  %v3915_v46 = vld [vmem:[%s4803_s9 + $0x6f0] ss:$24 sps:$4 sm:$0xff]   ;;  %v3974_v22 = vld [vmem:[%s4803_s9 + $0x2ac] ss:$24 sps:$4 sm:$0xff]  }
  0xb9   : > { %2080 = vmatpush1.bf16.msra.mxu0 %v3842_v47  ;;  %2038 = vmatprep.subr.bf16.mxu1 %v3843_v48  ;;  %v3918_v47 = vld [vmem:[%s4803_s9 + $0xf8] ss:$24 sps:$4 sm:$0xff]   ;;  %v3923_v48 = vld [vmem:[%s4803_s9 + $0x724] ss:$24 sps:$4 sm:$0xff]  }
  0xba   : > { %2081 = vmatprep.subr.bf16.mxu0 %v3845_v49  ;;  %v3926_v49 = vld [vmem:[%s4803_s9 + $0x12c] ss:$24 sps:$4 sm:$0xff]  }
  0xbc   : > { %2039 = vmatpush1.bf16.msra.mxu1 %v3847_v50  ;;  %v3921_v50 = vld [vmem:[%s4803_s9 + $0x720] ss:$24 sps:$4 sm:$0xff]  }
  0xbd   : > { %2082 = vmatpush1.bf16.msra.mxu0 %v3848_v51  ;;  %2040 = vmatprep.subr.bf16.mxu1 %v3849_v52  ;;  %v3924_v51 = vld [vmem:[%s4803_s9 + $0x128] ss:$24 sps:$4 sm:$0xff]   ;;  %v3929_v52 = vld [vmem:[%s4803_s9 + $0x754] ss:$24 sps:$4 sm:$0xff]  }
  0xbe   : > { %2083 = vmatprep.subr.bf16.mxu0 %v3851_v53  ;;  %v279_v53 = vld [vmem:[#allocation2 + $0x28] sm:$0xff] }
  0xc0   : > { %2041 = vmatpush1.bf16.msra.mxu1 %v3853_v54  ;;  %v285_v54 = vld [vmem:[#allocation2 + $0x58] sm:$0xff] }
  0xc1   : > { %2084 = vmatpush1.bf16.msra.mxu0 %v3854_v55  ;;  %2042 = vmatprep.subr.bf16.mxu1 %v3855_v56  ;;  %v3932_v55 = vld [vmem:[%s4803_s9 + $0x15c] ss:$24 sps:$4 sm:$0xff]   ;;  %v4926_v56 = vpack.c.bf16 %v285_v54, %v279_v53 }
  0xc2   : > { %2085 = vmatprep.subr.bf16.mxu0 %v3857_v57  ;;  %v3927_v57 = vld [vmem:[%s4803_s9 + $0x750] ss:$24 sps:$4 sm:$0xff]   ;;  %v4013_v53 = vld [vmem:[%s4803_s9 + $0x3fc] ss:$24 sps:$4 sm:$0xff]  }
  0xc3   : > { %v4016_v54 = vld [vmem:[%s4803_s9 + $0x104] ss:$24 sps:$4 sm:$0xff]  }
  0xc4   : > { %2043 = vmatpush1.bf16.msra.mxu1 %v3859_v58  ;;  %v3930_v58 = vld [vmem:[%s4803_s9 + $0x158] ss:$24 sps:$4 sm:$0xff]  }
  0xc5   : > { %2086 = vmatpush1.bf16.msra.mxu0 %v3860_v59  ;;  %2044 = vmatprep.subr.bf16.mxu1 %v3861_v0  ;;  %v3935_v59 = vld [vmem:[%s4803_s9 + $0x784] ss:$24 sps:$4 sm:$0xff]  }
  0xc6   : > { %2087 = vmatprep.subr.bf16.mxu0 %v3863_v3  ;;  %v3944_v0 = vld [vmem:[%s4803_s9 + $0x1bc] ss:$24 sps:$4 sm:$0xff]   ;;  %v3939_v3 = vld [vmem:[%s4803_s9 + $0x7b0] ss:$24 sps:$4 sm:$0xff]  }
  0xc8   : > { %2045 = vmatpush1.bf16.msra.mxu1 %v3865_v4  ;;  %v3942_v4 = vld [vmem:[%s4803_s9 + $0x1b8] ss:$24 sps:$4 sm:$0xff]  }
  0xc9   : > { %2088 = vmatpush1.bf16.msra.mxu0 %v3866_v5  ;;  %2046 = vmatprep.subr.bf16.mxu1 %v3867_v6  ;;  %v3947_v5 = vld [vmem:[%s4803_s9 + $0x7e4] ss:$24 sps:$4 sm:$0xff]  }
  0xca   : > { %2089 = vmatprep.subr.bf16.mxu0 %v3869_v7  ;;  %v3950_v6 = vld [vmem:[%s4803_s9 + $0x1ec] ss:$24 sps:$4 sm:$0xff]   ;;  %v3945_v7 = vld [vmem:[%s4803_s9 + $0x7e0] ss:$24 sps:$4 sm:$0xff]  }
  0xcc   : > { %2047 = vmatpush1.bf16.msra.mxu1 %v3871_v8  ;;  %v3948_v8 = vld [vmem:[%s4803_s9 + $0x1e8] ss:$24 sps:$4 sm:$0xff]  }
  0xcd   : > { %2090 = vmatpush1.bf16.msra.mxu0 %v3872_v9  ;;  %2048 = vmatprep.subr.bf16.mxu1 %v3873_v10  ;;  %v3953_v9 = vld [vmem:[%s4803_s9 + $0x814] ss:$24 sps:$4 sm:$0xff]  }
  0xce   : > { %2091 = vmatprep.subr.bf16.mxu0 %v3875_v11  ;;  %v3956_v10 = vld [vmem:[%s4803_s9 + $0x21c] ss:$24 sps:$4 sm:$0xff]   ;;  %v3951_v11 = vld [vmem:[%s4803_s9 + $0x810] ss:$24 sps:$4 sm:$0xff]  }
  0xd0   : > { %2049 = vmatpush1.bf16.msra.mxu1 %v3877_v12  ;;  %v3954_v12 = vld [vmem:[%s4803_s9 + $0x218] ss:$24 sps:$4 sm:$0xff]  }
  0xd1   : > { %2092 = vmatpush1.bf16.msra.mxu0 %v3878_v13  ;;  %2050 = vmatprep.subr.bf16.mxu1 %v3879_v14  ;;  %v3959_v13 = vld [vmem:[%s4803_s9 + $0x844] ss:$24 sps:$4 sm:$0xff]  }
  0xd2   : > { %2093 = vmatprep.subr.bf16.mxu0 %v3881_v15  ;;  %v3962_v14 = vld [vmem:[%s4803_s9 + $0x24c] ss:$24 sps:$4 sm:$0xff]   ;;  %v3957_v15 = vld [vmem:[%s4803_s9 + $0x840] ss:$24 sps:$4 sm:$0xff]  }
  0xd4   : > { %2051 = vmatpush1.bf16.msra.mxu1 %v3883_v16  ;;  %v3960_v16 = vld [vmem:[%s4803_s9 + $0x248] ss:$24 sps:$4 sm:$0xff]  }
  0xd5   : > { %2094 = vmatpush1.bf16.msra.mxu0 %v3884_v17  ;;  %2149 = vmatprep.subr.bf16.mxu1 %v3890_v23  ;;  %v3965_v17 = vld [vmem:[%s4803_s9 + $0x874] ss:$24 sps:$4 sm:$0xff]   ;;  %v3969_v23 = vld [vmem:[%s4803_s9 + $0x8a0] ss:$24 sps:$4 sm:$0xff]  }
  0xd6   : > { %2106 = vmatprep.subr.bf16.mxu0 %v3887_v19  ;;  %v3963_v19 = vld [vmem:[%s4803_s9 + $0x870] ss:$24 sps:$4 sm:$0xff]  }
  0xd7   : > { %2053 = vmatmul.mubr.bf16.vlgmr.msra.gmra.mrb[0].mxu1 %v4893_v26 }
  0xd8   : > { %2096 = vmatmul.mubr.bf16.vlgmr.msra.gmra.mrb[0].mxu0 %v4895_v27  ;;  %2150 = vmatpush1.bf16.msra.mxu1 %v3888_v25  ;;  %v3977_v25 = vld [vmem:[%s4803_s9 + $0x8d4] ss:$24 sps:$4 sm:$0xff]  }
  0xd9   : > { %2107 = vmatpush1.bf16.msra.mxu0 %v3885_v24  ;;  %2151 = vmatprep.subr.bf16.mxu1 %v3896_v29  ;;  %v3972_v24 = vld [vmem:[%s4803_s9 + $0x2a8] ss:$24 sps:$4 sm:$0xff]  }
  0xda   : > { %2108 = vmatprep.subr.bf16.mxu0 %v3893_v28  ;;  %2181 = vmatprep.mubr.bf16.mxu1 %v4868_v1  ;;  %v3980_v28 = vld [vmem:[%s4803_s9 + $0x2dc] ss:$24 sps:$4 sm:$0xff]   ;;  %v3975_v29 = vld [vmem:[%s4803_s9 + $0x8d0] ss:$24 sps:$4 sm:$0xff]  }
  0xdb   : > { %2138 = vmatprep.mubr.bf16.mxu0 %v4926_v56 }
  0xdc   : > { %2152 = vmatpush1.bf16.msra.mxu1 %v3894_v31  ;;  %v4963_v31 = vld [vmem:[#allocation2 + $0x20] sm:$0xff] }
  0xdd   : > { %2109 = vmatpush1.bf16.msra.mxu0 %v3891_v30  ;;  %2153 = vmatprep.subr.bf16.mxu1 %v3902_v33  ;;  %v3978_v30 = vld [vmem:[%s4803_s9 + $0x2d8] ss:$24 sps:$4 sm:$0xff]   ;;  %v3983_v33 = vld [vmem:[%s4803_s9 + $0x30c] ss:$24 sps:$4 sm:$0xff]  }
  0xde   : > { %2110 = vmatprep.subr.bf16.mxu0 %v3899_v32  ;;  %v284_v32 = vld [vmem:[#allocation2 + $0x50] sm:$0xff] }
  0xe0   : > { %2154 = vmatpush1.bf16.msra.mxu1 %v3900_v35  ;;  %v4968_v35 = vpack.c.bf16 %v284_v32, %v4963_v31  ;;  %v4070_v32 = vld [vmem:[%s4803_s9 + $0x2b4] ss:$24 sps:$4 sm:$0xff]  }
  0xe1   : > { %2111 = vmatpush1.bf16.msra.mxu0 %v3897_v34  ;;  %2155 = vmatprep.subr.bf16.mxu1 %v3908_v37  ;;  %v3986_v34 = vld [vmem:[%s4803_s9 + $0x14] ss:$24 sps:$4 sm:$0xff]   ;;  %v3984_v37 = vld [vmem:[%s4803_s9 + $0x10] ss:$24 sps:$4 sm:$0xff]  }
  0xe2   : > { %2112 = vmatprep.subr.bf16.mxu0 %v3905_v36  ;;  %v3981_v36 = vld [vmem:[%s4803_s9 + $0x308] ss:$24 sps:$4 sm:$0xff]  }
  0xe4   : > { %2156 = vmatpush1.bf16.msra.mxu1 %v3906_v39  ;;  %v3992_v39 = vld [vmem:[%s4803_s9 + $0x44] ss:$24 sps:$4 sm:$0xff]  }
  0xe5   : > { %2113 = vmatpush1.bf16.msra.mxu0 %v3903_v38  ;;  %2157 = vmatprep.subr.bf16.mxu1 %v3914_v41  ;;  %v3989_v38 = vld [vmem:[%s4803_s9 + $0x33c] ss:$24 sps:$4 sm:$0xff]   ;;  %v3990_v41 = vld [vmem:[%s4803_s9 + $0x40] ss:$24 sps:$4 sm:$0xff]  }
  0xe6   : > { %2114 = vmatprep.subr.bf16.mxu0 %v3911_v40  ;;  %v3987_v40 = vld [vmem:[%s4803_s9 + $0x338] ss:$24 sps:$4 sm:$0xff]  }
  0xe8   : > { %2158 = vmatpush1.bf16.msra.mxu1 %v3912_v43  ;;  %v3998_v43 = vld [vmem:[%s4803_s9 + $0x74] ss:$24 sps:$4 sm:$0xff]  }
  0xe9   : > { %2115 = vmatpush1.bf16.msra.mxu0 %v3909_v42  ;;  %2159 = vmatprep.subr.bf16.mxu1 %v3920_v45  ;;  %v3995_v42 = vld [vmem:[%s4803_s9 + $0x36c] ss:$24 sps:$4 sm:$0xff]   ;;  %v3996_v45 = vld [vmem:[%s4803_s9 + $0x70] ss:$24 sps:$4 sm:$0xff]  }
  0xea   : > { %2116 = vmatprep.subr.bf16.mxu0 %v3917_v44  ;;  %v3993_v44 = vld [vmem:[%s4803_s9 + $0x368] ss:$24 sps:$4 sm:$0xff]  }
  0xec   : > { %2160 = vmatpush1.bf16.msra.mxu1 %v3918_v47  ;;  %v4004_v47 = vld [vmem:[%s4803_s9 + $0xa4] ss:$24 sps:$4 sm:$0xff]  }
  0xed   : > { %2117 = vmatpush1.bf16.msra.mxu0 %v3915_v46  ;;  %2161 = vmatprep.subr.bf16.mxu1 %v3926_v49  ;;  %v4001_v46 = vld [vmem:[%s4803_s9 + $0x39c] ss:$24 sps:$4 sm:$0xff]   ;;  %v4002_v49 = vld [vmem:[%s4803_s9 + $0xa0] ss:$24 sps:$4 sm:$0xff]  }
  0xee   : > { %2118 = vmatprep.subr.bf16.mxu0 %v3923_v48  ;;  %v3999_v48 = vld [vmem:[%s4803_s9 + $0x398] ss:$24 sps:$4 sm:$0xff]  }
  0xf0   : > { %2162 = vmatpush1.bf16.msra.mxu1 %v3924_v51  ;;  %v4005_v51 = vld [vmem:[%s4803_s9 + $0x3c8] ss:$24 sps:$4 sm:$0xff]  }
  0xf1   : > { %2119 = vmatpush1.bf16.msra.mxu0 %v3921_v50  ;;  %2163 = vmatprep.subr.bf16.mxu1 %v3932_v55  ;;  %v4010_v50 = vld [vmem:[%s4803_s9 + $0xd4] ss:$24 sps:$4 sm:$0xff]   ;;  %v4011_v55 = vld [vmem:[%s4803_s9 + $0x3f8] ss:$24 sps:$4 sm:$0xff]  }
  0xf2   : > { %2120 = vmatprep.subr.bf16.mxu0 %v3929_v52  ;;  %v4008_v52 = vld [vmem:[%s4803_s9 + $0xd0] ss:$24 sps:$4 sm:$0xff]  }
  0xf4   : > { %2164 = vmatpush1.bf16.msra.mxu1 %v3930_v58  ;;  %v4019_v58 = vld [vmem:[%s4803_s9 + $0x42c] ss:$24 sps:$4 sm:$0xff]  }
  0xf5   : > { %2121 = vmatpush1.bf16.msra.mxu0 %v3927_v57  ;;  %2165 = vmatprep.subr.bf16.mxu1 %v3938_v60  ;;  %v4014_v57 = vld [vmem:[%s4803_s9 + $0x100] ss:$24 sps:$4 sm:$0xff]  }
  0xf6   : > { %2122 = vmatprep.subr.bf16.mxu0 %v3935_v59  ;;  %v4022_v59 = vld [vmem:[%s4803_s9 + $0x134] ss:$24 sps:$4 sm:$0xff]   ;;  %v4017_v60 = vld [vmem:[%s4803_s9 + $0x428] ss:$24 sps:$4 sm:$0xff]  }
  0xf8   : > { %2166 = vmatpush1.bf16.msra.mxu1 %v3936_v62  ;;  %v4025_v62 = vld [vmem:[%s4803_s9 + $0x45c] ss:$24 sps:$4 sm:$0xff]  }
  0xf9   : > { %2123 = vmatpush1.bf16.msra.mxu0 %v3933_v61  ;;  %2167 = vmatprep.subr.bf16.mxu1 %v3944_v0  ;;  %v4020_v61 = vld [vmem:[%s4803_s9 + $0x130] ss:$24 sps:$4 sm:$0xff]  }
  0xfa   : > { %2124 = vmatprep.subr.bf16.mxu0 %v3941_v63  ;;  %v4028_v63 = vld [vmem:[%s4803_s9 + $0x164] ss:$24 sps:$4 sm:$0xff]   ;;  %v4023_v0 = vld [vmem:[%s4803_s9 + $0x458] ss:$24 sps:$4 sm:$0xff]  }
  0xfc   : > { %2168 = vmatpush1.bf16.msra.mxu1 %v3942_v4  ;;  %v4031_v4 = vld [vmem:[%s4803_s9 + $0x48c] ss:$24 sps:$4 sm:$0xff]  }
  0xfd   : > { %2125 = vmatpush1.bf16.msra.mxu0 %v3939_v3  ;;  %2169 = vmatprep.subr.bf16.mxu1 %v3950_v6  ;;  %v4026_v3 = vld [vmem:[%s4803_s9 + $0x160] ss:$24 sps:$4 sm:$0xff]  }
  0xfe   : > { %2126 = vmatprep.subr.bf16.mxu0 %v3947_v5  ;;  %v4034_v5 = vld [vmem:[%s4803_s9 + $0x194] ss:$24 sps:$4 sm:$0xff]   ;;  %v4029_v6 = vld [vmem:[%s4803_s9 + $0x488] ss:$24 sps:$4 sm:$0xff]  }
 0x100   : > { %2170 = vmatpush1.bf16.msra.mxu1 %v3948_v8  ;;  %v4037_v8 = vld [vmem:[%s4803_s9 + $0x4bc] ss:$24 sps:$4 sm:$0xff]  }
 0x101   : > { %2127 = vmatpush1.bf16.msra.mxu0 %v3945_v7  ;;  %2171 = vmatprep.subr.bf16.mxu1 %v3956_v10  ;;  %v4032_v7 = vld [vmem:[%s4803_s9 + $0x190] ss:$24 sps:$4 sm:$0xff]  }
 0x102   : > { %2128 = vmatprep.subr.bf16.mxu0 %v3953_v9  ;;  %v4040_v9 = vld [vmem:[%s4803_s9 + $0x1c4] ss:$24 sps:$4 sm:$0xff]   ;;  %v4035_v10 = vld [vmem:[%s4803_s9 + $0x4b8] ss:$24 sps:$4 sm:$0xff]  }
 0x104   : > { %2172 = vmatpush1.bf16.msra.mxu1 %v3954_v12  ;;  %v4043_v12 = vld [vmem:[%s4803_s9 + $0x4ec] ss:$24 sps:$4 sm:$0xff]  }
 0x105   : > { %2129 = vmatpush1.bf16.msra.mxu0 %v3951_v11  ;;  %2173 = vmatprep.subr.bf16.mxu1 %v3962_v14  ;;  %v4038_v11 = vld [vmem:[%s4803_s9 + $0x1c0] ss:$24 sps:$4 sm:$0xff]  }
 0x106   : > { %2130 = vmatprep.subr.bf16.mxu0 %v3959_v13  ;;  %v4046_v13 = vld [vmem:[%s4803_s9 + $0x1f4] ss:$24 sps:$4 sm:$0xff]   ;;  %v4041_v14 = vld [vmem:[%s4803_s9 + $0x4e8] ss:$24 sps:$4 sm:$0xff]  }
 0x108   : > { %2174 = vmatpush1.bf16.msra.mxu1 %v3960_v16  ;;  %v4049_v16 = vld [vmem:[%s4803_s9 + $0x51c] ss:$24 sps:$4 sm:$0xff]  }
 0x109   : > { %2131 = vmatpush1.bf16.msra.mxu0 %v3957_v15  ;;  %2175 = vmatprep.subr.bf16.mxu1 %v3968_v18  ;;  %v4044_v15 = vld [vmem:[%s4803_s9 + $0x1f0] ss:$24 sps:$4 sm:$0xff]  }
 0x10a   : > { %2132 = vmatprep.subr.bf16.mxu0 %v3965_v17  ;;  %v4052_v17 = vld [vmem:[%s4803_s9 + $0x224] ss:$24 sps:$4 sm:$0xff]   ;;  %v4047_v18 = vld [vmem:[%s4803_s9 + $0x518] ss:$24 sps:$4 sm:$0xff]  }
 0x10c   : > { %2176 = vmatpush1.bf16.msra.mxu1 %v3966_v20  ;;  %v4055_v20 = vld [vmem:[%s4803_s9 + $0x54c] ss:$24 sps:$4 sm:$0xff]  }
 0x10d   : > { %2133 = vmatpush1.bf16.msra.mxu0 %v3963_v19  ;;  %2177 = vmatprep.subr.bf16.mxu1 %v3974_v22  ;;  %v4050_v19 = vld [vmem:[%s4803_s9 + $0x220] ss:$24 sps:$4 sm:$0xff]  }
 0x10e   : > { %2134 = vmatprep.subr.bf16.mxu0 %v3971_v21  ;;  %v4058_v21 = vld [vmem:[%s4803_s9 + $0x254] ss:$24 sps:$4 sm:$0xff]   ;;  %v4053_v22 = vld [vmem:[%s4803_s9 + $0x548] ss:$24 sps:$4 sm:$0xff]  }
 0x110   : > { %2178 = vmatpush1.bf16.msra.mxu1 %v3972_v24  ;;  %v4061_v24 = vld [vmem:[%s4803_s9 + $0x57c] ss:$24 sps:$4 sm:$0xff]  }
 0x111   : > { %2135 = vmatpush1.bf16.msra.mxu0 %v3969_v23  ;;  %2179 = vmatprep.subr.bf16.mxu1 %v3980_v28  ;;  %v4056_v23 = vld [vmem:[%s4803_s9 + $0x250] ss:$24 sps:$4 sm:$0xff]  }
 0x112   : > { %2136 = vmatprep.subr.bf16.mxu0 %v3977_v25  ;;  %v4064_v25 = vld [vmem:[%s4803_s9 + $0x284] ss:$24 sps:$4 sm:$0xff]   ;;  %v4059_v28 = vld [vmem:[%s4803_s9 + $0x578] ss:$24 sps:$4 sm:$0xff]  }
 0x114   : > { %2180 = vmatpush1.bf16.msra.mxu1 %v3978_v30  ;;  %v4067_v30 = vld [vmem:[%s4803_s9 + $0x5ac] ss:$24 sps:$4 sm:$0xff]  }
 0x115   : > { %2137 = vmatpush1.bf16.msra.mxu0 %v3975_v29  ;;  %2192 = vmatprep.subr.bf16.mxu1 %v3983_v33  ;;  %v4062_v29 = vld [vmem:[%s4803_s9 + $0x280] ss:$24 sps:$4 sm:$0xff]  }
 0x116   : > { %2278 = vmatprep.subr.bf16.mxu0 %v3986_v34  ;;  %v4065_v33 = vld [vmem:[%s4803_s9 + $0x5a8] ss:$24 sps:$4 sm:$0xff]  }
 0x117   : > { %2182 = vmatmul.mubr.bf16.vlgmr.msra.gmra.mrb[4].mxu1 %v4893_v26  ;;  %v4068_v34 = vld [vmem:[%s4803_s9 + $0x2b0] ss:$24 sps:$4 sm:$0xff]  }
 0x118   : > { %2139 = vmatmul.mubr.bf16.vlgmr.msra.gmra.mrb[0].mxu0 %v4968_v35  ;;  %2193 = vmatpush1.bf16.msra.mxu1 %v3981_v36  ;;  %v4073_v36 = vld [vmem:[%s4803_s9 + $0x5dc] ss:$24 sps:$4 sm:$0xff]  }
 0x119   : > { %2279 = vmatpush1.bf16.msra.mxu0 %v3984_v37  ;;  %2194 = vmatprep.subr.bf16.mxu1 %v3989_v38  ;;  %v4076_v37 = vld [vmem:[%s4803_s9 + $0x2e4] ss:$24 sps:$4 sm:$0xff]   ;;  %v4071_v38 = vld [vmem:[%s4803_s9 + $0x5d8] ss:$24 sps:$4 sm:$0xff]  }
 0x11a   : > { %2280 = vmatprep.subr.bf16.mxu0 %v3992_v39  ;;  %2224 = vmatprep.mubr.bf16.mxu1 %v4870_v2  ;;  %v4074_v39 = vld [vmem:[%s4803_s9 + $0x2e0] ss:$24 sps:$4 sm:$0xff]  }
 0x11b   : > { %2310 = vmatprep.mubr.bf16.mxu0 %v4868_v1  ;;  %v4007_v1 = vld [vmem:[%s4803_s9 + $0x3cc] ss:$24 sps:$4 sm:$0xff]  }
 0x11c   : > { %2195 = vmatpush1.bf16.msra.mxu1 %v3987_v40  ;;  %v4079_v40 = vld [vmem:[%s4803_s9 + $0x60c] ss:$24 sps:$4 sm:$0xff]  }
 0x11d   : > { %2281 = vmatpush1.bf16.msra.mxu0 %v3990_v41  ;;  %2196 = vmatprep.subr.bf16.mxu1 %v3995_v42  ;;  %v4082_v41 = vld [vmem:[%s4803_s9 + $0x314] ss:$24 sps:$4 sm:$0xff]   ;;  %v4077_v42 = vld [vmem:[%s4803_s9 + $0x608] ss:$24 sps:$4 sm:$0xff]  }
 0x11e   : > { %2282 = vmatprep.subr.bf16.mxu0 %v3998_v43  ;;  %v4080_v43 = vld [vmem:[%s4803_s9 + $0x310] ss:$24 sps:$4 sm:$0xff]  }
 0x120   : > { %2197 = vmatpush1.bf16.msra.mxu1 %v3993_v44  ;;  %v4085_v44 = vld [vmem:[%s4803_s9 + $0x63c] ss:$24 sps:$4 sm:$0xff]  }
 0x121   : > { %2283 = vmatpush1.bf16.msra.mxu0 %v3996_v45  ;;  %2198 = vmatprep.subr.bf16.mxu1 %v4001_v46  ;;  %v4088_v45 = vld [vmem:[%s4803_s9 + $0x344] ss:$24 sps:$4 sm:$0xff]   ;;  %v4083_v46 = vld [vmem:[%s4803_s9 + $0x638] ss:$24 sps:$4 sm:$0xff]  }
 0x122   : > { %2284 = vmatprep.subr.bf16.mxu0 %v4004_v47  ;;  %v4086_v47 = vld [vmem:[%s4803_s9 + $0x340] ss:$24 sps:$4 sm:$0xff]  }
 0x124   : > { %2199 = vmatpush1.bf16.msra.mxu1 %v3999_v48  ;;  %v4091_v48 = vld [vmem:[%s4803_s9 + $0x66c] ss:$24 sps:$4 sm:$0xff]  }
 0x125   : > { %2285 = vmatpush1.bf16.msra.mxu0 %v4002_v49  ;;  %2200 = vmatprep.subr.bf16.mxu1 %v4007_v1  ;;  %v4094_v49 = vld [vmem:[%s4803_s9 + $0x374] ss:$24 sps:$4 sm:$0xff]   ;;  %v4092_v1 = vld [vmem:[%s4803_s9 + $0x370] ss:$24 sps:$4 sm:$0xff]  }
 0x126   : > { %2286 = vmatprep.subr.bf16.mxu0 %v4010_v50  ;;  %v4097_v50 = vld [vmem:[%s4803_s9 + $0x69c] ss:$24 sps:$4 sm:$0xff]  }
 0x128   : > { %2201 = vmatpush1.bf16.msra.mxu1 %v4005_v51  ;;  %v4100_v51 = vld [vmem:[%s4803_s9 + $0x3a4] ss:$24 sps:$4 sm:$0xff]  }
 0x129   : > { %2287 = vmatpush1.bf16.msra.mxu0 %v4008_v52  ;;  %2202 = vmatprep.subr.bf16.mxu1 %v4013_v53  ;;  %v4095_v52 = vld [vmem:[%s4803_s9 + $0x698] ss:$24 sps:$4 sm:$0xff]  }
 0x12a   : > { %2288 = vmatprep.subr.bf16.mxu0 %v4016_v54  ;;  %v4098_v53 = vld [vmem:[%s4803_s9 + $0x3a0] ss:$24 sps:$4 sm:$0xff]   ;;  %v4106_v54 = vld [vmem:[%s4803_s9 + $0x3d4] ss:$24 sps:$4 sm:$0xff]  }
 0x12c   : > { %2203 = vmatpush1.bf16.msra.mxu1 %v4011_v55  ;;  %v4101_v55 = vld [vmem:[%s4803_s9 + $0x6c8] ss:$24 sps:$4 sm:$0xff]  }
 0x12d   : > { %2289 = vmatpush1.bf16.msra.mxu0 %v4014_v57  ;;  %2204 = vmatprep.subr.bf16.mxu1 %v4019_v58  ;;  %v4104_v57 = vld [vmem:[%s4803_s9 + $0x3d0] ss:$24 sps:$4 sm:$0xff]   ;;  %v4109_v58 = vld [vmem:[%s4803_s9 + $0x6fc] ss:$24 sps:$4 sm:$0xff]  }
 0x12e   : > { %2290 = vmatprep.subr.bf16.mxu0 %v4022_v59  ;;  %v4112_v59 = vld [vmem:[%s4803_s9 + $0x404] ss:$24 sps:$4 sm:$0xff]  }
 0x130   : > { %2205 = vmatpush1.bf16.msra.mxu1 %v4017_v60  ;;  %v4107_v60 = vld [vmem:[%s4803_s9 + $0x6f8] ss:$24 sps:$4 sm:$0xff]  }
 0x131   : > { %2291 = vmatpush1.bf16.msra.mxu0 %v4020_v61  ;;  %2206 = vmatprep.subr.bf16.mxu1 %v4025_v62  ;;  %v4110_v61 = vld [vmem:[%s4803_s9 + $0x400] ss:$24 sps:$4 sm:$0xff]   ;;  %v4115_v62 = vld [vmem:[%s4803_s9 + $0x72c] ss:$24 sps:$4 sm:$0xff]  }
 0x132   : > { %2292 = vmatprep.subr.bf16.mxu0 %v4028_v63  ;;  %v4118_v63 = vld [vmem:[%s4803_s9 + $0x434] ss:$24 sps:$4 sm:$0xff]  }
 0x134   : > { %2207 = vmatpush1.bf16.msra.mxu1 %v4023_v0  ;;  %v4113_v0 = vld [vmem:[%s4803_s9 + $0x728] ss:$24 sps:$4 sm:$0xff]  }
 0x135   : > { %2293 = vmatpush1.bf16.msra.mxu0 %v4026_v3  ;;  %2208 = vmatprep.subr.bf16.mxu1 %v4031_v4  ;;  %v4116_v3 = vld [vmem:[%s4803_s9 + $0x430] ss:$24 sps:$4 sm:$0xff]   ;;  %v4121_v4 = vld [vmem:[%s4803_s9 + $0x75c] ss:$24 sps:$4 sm:$0xff]  }
 0x136   : > { %2294 = vmatprep.subr.bf16.mxu0 %v4034_v5  ;;  %v4124_v5 = vld [vmem:[%s4803_s9 + $0x464] ss:$24 sps:$4 sm:$0xff]  }
 0x138   : > { %2209 = vmatpush1.bf16.msra.mxu1 %v4029_v6  ;;  %v4119_v6 = vld [vmem:[%s4803_s9 + $0x758] ss:$24 sps:$4 sm:$0xff]  }
 0x139   : > { %2295 = vmatpush1.bf16.msra.mxu0 %v4032_v7  ;;  %2210 = vmatprep.subr.bf16.mxu1 %v4037_v8  ;;  %v4122_v7 = vld [vmem:[%s4803_s9 + $0x460] ss:$24 sps:$4 sm:$0xff]   ;;  %v4127_v8 = vld [vmem:[%s4803_s9 + $0x78c] ss:$24 sps:$4 sm:$0xff]  }
 0x13a   : > { %2296 = vmatprep.subr.bf16.mxu0 %v4040_v9  ;;  %v4130_v9 = vld [vmem:[%s4803_s9 + $0x494] ss:$24 sps:$4 sm:$0xff]  }
 0x13c   : > { %2211 = vmatpush1.bf16.msra.mxu1 %v4035_v10  ;;  %v4125_v10 = vld [vmem:[%s4803_s9 + $0x788] ss:$24 sps:$4 sm:$0xff]  }
 0x13d   : > { %2297 = vmatpush1.bf16.msra.mxu0 %v4038_v11  ;;  %2212 = vmatprep.subr.bf16.mxu1 %v4043_v12  ;;  %v4128_v11 = vld [vmem:[%s4803_s9 + $0x490] ss:$24 sps:$4 sm:$0xff]   ;;  %v4133_v12 = vld [vmem:[%s4803_s9 + $0x7bc] ss:$24 sps:$4 sm:$0xff]  }
 0x13e   : > { %2298 = vmatprep.subr.bf16.mxu0 %v4046_v13  ;;  %v4136_v13 = vld [vmem:[%s4803_s9 + $0x4c4] ss:$24 sps:$4 sm:$0xff]  }
 0x140   : > { %2213 = vmatpush1.bf16.msra.mxu1 %v4041_v14  ;;  %v4131_v14 = vld [vmem:[%s4803_s9 + $0x7b8] ss:$24 sps:$4 sm:$0xff]  }
 0x141   : > { %2299 = vmatpush1.bf16.msra.mxu0 %v4044_v15  ;;  %2214 = vmatprep.subr.bf16.mxu1 %v4049_v16  ;;  %v4134_v15 = vld [vmem:[%s4803_s9 + $0x4c0] ss:$24 sps:$4 sm:$0xff]   ;;  %v4139_v16 = vld [vmem:[%s4803_s9 + $0x7ec] ss:$24 sps:$4 sm:$0xff]  }
 0x142   : > { %2300 = vmatprep.subr.bf16.mxu0 %v4052_v17  ;;  %v4142_v17 = vld [vmem:[%s4803_s9 + $0x4f4] ss:$24 sps:$4 sm:$0xff]  }
 0x144   : > { %2215 = vmatpush1.bf16.msra.mxu1 %v4047_v18  ;;  %v4137_v18 = vld [vmem:[%s4803_s9 + $0x7e8] ss:$24 sps:$4 sm:$0xff]  }
 0x145   : > { %2301 = vmatpush1.bf16.msra.mxu0 %v4050_v19  ;;  %2216 = vmatprep.subr.bf16.mxu1 %v4055_v20  ;;  %v4140_v19 = vld [vmem:[%s4803_s9 + $0x4f0] ss:$24 sps:$4 sm:$0xff]   ;;  %v4145_v20 = vld [vmem:[%s4803_s9 + $0x81c] ss:$24 sps:$4 sm:$0xff]  }
 0x146   : > { %2302 = vmatprep.subr.bf16.mxu0 %v4058_v21  ;;  %v4148_v21 = vld [vmem:[%s4803_s9 + $0x524] ss:$24 sps:$4 sm:$0xff]  }
 0x148   : > { %2217 = vmatpush1.bf16.msra.mxu1 %v4053_v22  ;;  %v4143_v22 = vld [vmem:[%s4803_s9 + $0x818] ss:$24 sps:$4 sm:$0xff]  }
 0x149   : > { %2303 = vmatpush1.bf16.msra.mxu0 %v4056_v23  ;;  %2218 = vmatprep.subr.bf16.mxu1 %v4061_v24  ;;  %v4146_v23 = vld [vmem:[%s4803_s9 + $0x520] ss:$24 sps:$4 sm:$0xff]   ;;  %v4151_v24 = vld [vmem:[%s4803_s9 + $0x84c] ss:$24 sps:$4 sm:$0xff]  }
 0x14a   : > { %2304 = vmatprep.subr.bf16.mxu0 %v4064_v25  ;;  %v4154_v25 = vld [vmem:[%s4803_s9 + $0x554] ss:$24 sps:$4 sm:$0xff]  }
 0x14c   : > { %2219 = vmatpush1.bf16.msra.mxu1 %v4059_v28  ;;  %v4149_v28 = vld [vmem:[%s4803_s9 + $0x848] ss:$24 sps:$4 sm:$0xff]  }
 0x14d   : > { %2305 = vmatpush1.bf16.msra.mxu0 %v4062_v29  ;;  %2220 = vmatprep.subr.bf16.mxu1 %v4067_v30  ;;  %v4152_v29 = vld [vmem:[%s4803_s9 + $0x550] ss:$24 sps:$4 sm:$0xff]   ;;  %v4157_v30 = vld [vmem:[%s4803_s9 + $0x87c] ss:$24 sps:$4 sm:$0xff]  }
 0x14e   : > { %2306 = vmatprep.subr.bf16.mxu0 %v4070_v32  ;;  %v4160_v32 = vld [vmem:[%s4803_s9 + $0x584] ss:$24 sps:$4 sm:$0xff]  }
 0x150   : > { %2221 = vmatpush1.bf16.msra.mxu1 %v4065_v33  ;;  %v4155_v33 = vld [vmem:[%s4803_s9 + $0x878] ss:$24 sps:$4 sm:$0xff]  }
 0x151   : > { %2307 = vmatpush1.bf16.msra.mxu0 %v4068_v34  ;;  %2222 = vmatprep.subr.bf16.mxu1 %v4073_v36  ;;  %v4158_v34 = vld [vmem:[%s4803_s9 + $0x580] ss:$24 sps:$4 sm:$0xff]   ;;  %v4163_v36 = vld [vmem:[%s4803_s9 + $0x8ac] ss:$24 sps:$4 sm:$0xff]  }
 0x152   : > { %2308 = vmatprep.subr.bf16.mxu0 %v4076_v37  ;;  %v4166_v37 = vld [vmem:[%s4803_s9 + $0x5b4] ss:$24 sps:$4 sm:$0xff]  }
 0x154   : > { %2223 = vmatpush1.bf16.msra.mxu1 %v4071_v38  ;;  %v4161_v38 = vld [vmem:[%s4803_s9 + $0x8a8] ss:$24 sps:$4 sm:$0xff]  }
 0x155   : > { %2309 = vmatpush1.bf16.msra.mxu0 %v4074_v39  ;;  %2235 = vmatprep.subr.bf16.mxu1 %v4079_v40  ;;  %v4164_v39 = vld [vmem:[%s4803_s9 + $0x5b0] ss:$24 sps:$4 sm:$0xff]   ;;  %v4169_v40 = vld [vmem:[%s4803_s9 + $0x8dc] ss:$24 sps:$4 sm:$0xff]  }
 0x156   : > { %2321 = vmatprep.subr.bf16.mxu0 %v4082_v41  ;;  %v4172_v41 = vld [vmem:[%s4803_s9 + $0x5e4] ss:$24 sps:$4 sm:$0xff]  }
 0x157   : > { %2225 = vmatmul.mubr.bf16.vlgmr.msra.gmra.mrb[4].mxu1 %v4895_v27 }
 0x158   : > { %2311 = vmatmul.mubr.bf16.vlgmr.msra.gmra.mrb[4].mxu0 %v4893_v26  ;;  %2236 = vmatpush1.bf16.msra.mxu1 %v4077_v42  ;;  %v4089_v26 = vld [vmem:[%s4803_s9 + $0x668] ss:$24 sps:$4 sm:$0xff]   ;;  %v4167_v42 = vld [vmem:[%s4803_s9 + $0x8d8] ss:$24 sps:$4 sm:$0xff]  }
 0x159   : > { %2322 = vmatpush1.bf16.msra.mxu0 %v4080_v43  ;;  %2237 = vmatprep.subr.bf16.mxu1 %v4085_v44  ;;  %v4170_v43 = vld [vmem:[%s4803_s9 + $0x5e0] ss:$24 sps:$4 sm:$0xff]   ;;  %v4175_v44 = vld [vmem:[%s4803_s9 + $0x614] ss:$24 sps:$4 sm:$0xff]  }
 0x15a   : > { %2323 = vmatprep.subr.bf16.mxu0 %v4088_v45  ;;  %2267 = vmatprep.mubr.bf16.mxu1 %v4926_v56  ;;  %v4173_v45 = vld [vmem:[%s4803_s9 + $0x610] ss:$24 sps:$4 sm:$0xff]  }
 0x15b   : > { %2353 = vmatprep.mubr.bf16.mxu0 %v4870_v2  ;;  %v4103_v2 = vld [vmem:[%s4803_s9 + $0x6cc] ss:$24 sps:$4 sm:$0xff]  }
 0x15c   : > { %2238 = vmatpush1.bf16.msra.mxu1 %v4083_v46  ;;  %v4178_v46 = vld [vmem:[%s4803_s9 + $0x644] ss:$24 sps:$4 sm:$0xff]  }
 0x15d   : > { %2324 = vmatpush1.bf16.msra.mxu0 %v4086_v47  ;;  %2239 = vmatprep.subr.bf16.mxu1 %v4091_v48  ;;  %v4176_v47 = vld [vmem:[%s4803_s9 + $0x640] ss:$24 sps:$4 sm:$0xff]   ;;  %v4181_v48 = vld [vmem:[%s4803_s9 + $0x674] ss:$24 sps:$4 sm:$0xff]  }
 0x15e   : > { %2325 = vmatprep.subr.bf16.mxu0 %v4094_v49  ;;  %v4179_v49 = vld [vmem:[%s4803_s9 + $0x670] ss:$24 sps:$4 sm:$0xff]  }
 0x160   : > { %2240 = vmatpush1.bf16.msra.mxu1 %v4089_v26  ;;  %v4184_v26 = vld [vmem:[%s4803_s9 + $0x6a4] ss:$24 sps:$4 sm:$0xff]  }
 0x161   : > { %2326 = vmatpush1.bf16.msra.mxu0 %v4092_v1  ;;  %2241 = vmatprep.subr.bf16.mxu1 %v4097_v50  ;;  %v4182_v1 = vld [vmem:[%s4803_s9 + $0x6a0] ss:$24 sps:$4 sm:$0xff]   ;;  %v4187_v50 = vld [vmem:[%s4803_s9 + $0x6d4] ss:$24 sps:$4 sm:$0xff]  }
 0x162   : > { %2327 = vmatprep.subr.bf16.mxu0 %v4100_v51  ;;  %v4190_v51 = vld [vmem:[%s4803_s9 + $0x704] ss:$24 sps:$4 sm:$0xff]  }
 0x164   : > { %2242 = vmatpush1.bf16.msra.mxu1 %v4095_v52  ;;  %v4193_v52 = vld [vmem:[%s4803_s9 + $0x734] ss:$24 sps:$4 sm:$0xff]  }
 0x165   : > { %2328 = vmatpush1.bf16.msra.mxu0 %v4098_v53  ;;  %2243 = vmatprep.subr.bf16.mxu1 %v4103_v2 }
 0x166   : > { %2329 = vmatprep.subr.bf16.mxu0 %v4106_v54  ;;  %v4191_v54 = vld [vmem:[%s4803_s9 + $0x730] ss:$24 sps:$4 sm:$0xff]  }
 0x168   : > { %2244 = vmatpush1.bf16.msra.mxu1 %v4101_v55 }
 0x169   : > { %2330 = vmatpush1.bf16.msra.mxu0 %v4104_v57  ;;  %2245 = vmatprep.subr.bf16.mxu1 %v4109_v58  ;;  %v4196_v57 = vld [vmem:[%s4803_s9 + $0x764] ss:$24 sps:$4 sm:$0xff]  }
 0x16a   : > { %2331 = vmatprep.subr.bf16.mxu0 %v4112_v59  ;;  %v4194_v59 = vld [vmem:[%s4803_s9 + $0x760] ss:$24 sps:$4 sm:$0xff]  }
 0x16c   : > { %2246 = vmatpush1.bf16.msra.mxu1 %v4107_v60  ;;  %v4199_v60 = vld [vmem:[%s4803_s9 + $0x794] ss:$24 sps:$4 sm:$0xff]  }
 0x16d   : > { %2332 = vmatpush1.bf16.msra.mxu0 %v4110_v61  ;;  %2247 = vmatprep.subr.bf16.mxu1 %v4115_v62  ;;  %v4197_v61 = vld [vmem:[%s4803_s9 + $0x790] ss:$24 sps:$4 sm:$0xff]   ;;  %v4202_v62 = vld [vmem:[%s4803_s9 + $0x7c4] ss:$24 sps:$4 sm:$0xff]  }
 0x16e   : > { %2333 = vmatprep.subr.bf16.mxu0 %v4118_v63  ;;  %v4200_v63 = vld [vmem:[%s4803_s9 + $0x7c0] ss:$24 sps:$4 sm:$0xff]  }
 0x170   : > { %2248 = vmatpush1.bf16.msra.mxu1 %v4113_v0  ;;  %v4205_v0 = vld [vmem:[%s4803_s9 + $0x7f4] ss:$24 sps:$4 sm:$0xff]  }
 0x171   : > { %2334 = vmatpush1.bf16.msra.mxu0 %v4116_v3  ;;  %2249 = vmatprep.subr.bf16.mxu1 %v4121_v4  ;;  %v4203_v3 = vld [vmem:[%s4803_s9 + $0x7f0] ss:$24 sps:$4 sm:$0xff]   ;;  %v4208_v4 = vld [vmem:[%s4803_s9 + $0x824] ss:$24 sps:$4 sm:$0xff]  }
 0x172   : > { %2335 = vmatprep.subr.bf16.mxu0 %v4124_v5  ;;  %v4206_v5 = vld [vmem:[%s4803_s9 + $0x820] ss:$24 sps:$4 sm:$0xff]  }
 0x174   : > { %2250 = vmatpush1.bf16.msra.mxu1 %v4119_v6  ;;  %v4211_v6 = vld [vmem:[%s4803_s9 + $0x854] ss:$24 sps:$4 sm:$0xff]  }
 0x175   : > { %2336 = vmatpush1.bf16.msra.mxu0 %v4122_v7  ;;  %2251 = vmatprep.subr.bf16.mxu1 %v4127_v8  ;;  %v4209_v7 = vld [vmem:[%s4803_s9 + $0x850] ss:$24 sps:$4 sm:$0xff]   ;;  %v4214_v8 = vld [vmem:[%s4803_s9 + $0x884] ss:$24 sps:$4 sm:$0xff]  }
 0x176   : > { %2337 = vmatprep.subr.bf16.mxu0 %v4130_v9  ;;  %v4212_v9 = vld [vmem:[%s4803_s9 + $0x880] ss:$24 sps:$4 sm:$0xff]  }
 0x178   : > { %2252 = vmatpush1.bf16.msra.mxu1 %v4125_v10  ;;  %v4217_v10 = vld [vmem:[%s4803_s9 + $0x8b4] ss:$24 sps:$4 sm:$0xff]  }
 0x179   : > { %2338 = vmatpush1.bf16.msra.mxu0 %v4128_v11  ;;  %2253 = vmatprep.subr.bf16.mxu1 %v4133_v12  ;;  %v4215_v11 = vld [vmem:[%s4803_s9 + $0x8b0] ss:$24 sps:$4 sm:$0xff]   ;;  %v4220_v12 = vld [vmem:[%s4803_s9 + $0x8e4] ss:$24 sps:$4 sm:$0xff]  }
 0x17a   : > { %2339 = vmatprep.subr.bf16.mxu0 %v4136_v13  ;;  %v4218_v13 = vld [vmem:[%s4803_s9 + $0x8e0] ss:$24 sps:$4 sm:$0xff]  }
 0x17c   : > { %2254 = vmatpush1.bf16.msra.mxu1 %v4131_v14 }
 0x17d   : > { %2340 = vmatpush1.bf16.msra.mxu0 %v4134_v15  ;;  %2255 = vmatprep.subr.bf16.mxu1 %v4139_v16 }
 0x17e   : > { %2341 = vmatprep.subr.bf16.mxu0 %v4142_v17 }
 0x180   : > { %2256 = vmatpush1.bf16.msra.mxu1 %v4137_v18 }
 0x181   : > { %2342 = vmatpush1.bf16.msra.mxu0 %v4140_v19  ;;  %2257 = vmatprep.subr.bf16.mxu1 %v4145_v20 }
 0x182   : > { %2343 = vmatprep.subr.bf16.mxu0 %v4148_v21 }
 0x184   : > { %2258 = vmatpush1.bf16.msra.mxu1 %v4143_v22 }
 0x185   : > { %2344 = vmatpush1.bf16.msra.mxu0 %v4146_v23  ;;  %2259 = vmatprep.subr.bf16.mxu1 %v4151_v24  ;;  %v4245_v24 = vld [vmem:[#allocation2] sm:$0xff] }
 0x186   : > { %2345 = vmatprep.subr.bf16.mxu0 %v4154_v25 }
 0x188   : > { %2260 = vmatpush1.bf16.msra.mxu1 %v4149_v28 }
 0x189   : > { %2346 = vmatpush1.bf16.msra.mxu0 %v4152_v29  ;;  %2261 = vmatprep.subr.bf16.mxu1 %v4157_v30  ;;  %v4246_v29 = vld [vmem:[#allocation2 + $0x8] sm:$0xff] }
 0x18a   : > { %2347 = vmatprep.subr.bf16.mxu0 %v4160_v32  ;;  %v4247_v32 = vld [vmem:[#allocation2 + $0x30] sm:$0xff] }
 0x18c   : > { %2262 = vmatpush1.bf16.msra.mxu1 %v4155_v33 }
 0x18d   : > { %2348 = vmatpush1.bf16.msra.mxu0 %v4158_v34  ;;  %2263 = vmatprep.subr.bf16.mxu1 %v4163_v36  ;;  %v4248_v34 = vld [vmem:[#allocation2 + $0x38] sm:$0xff] }
 0x18e   : > { %2349 = vmatprep.subr.bf16.mxu0 %v4166_v37 }
 0x190   : > { %2264 = vmatpush1.bf16.msra.mxu1 %v4161_v38 }
 0x191   : > { %2350 = vmatpush1.bf16.msra.mxu0 %v4164_v39  ;;  %2265 = vmatprep.subr.bf16.mxu1 %v4169_v40 }
 0x192   : > { %2351 = vmatprep.subr.bf16.mxu0 %v4172_v41 }
 0x194   : > { %2266 = vmatpush1.bf16.msra.mxu1 %v4167_v42 }
 0x195   : > { %2352 = vmatpush1.bf16.msra.mxu0 %v4170_v43  ;;  %v4249_v43 = vld [vmem:[#allocation2 + $0x10] sm:$0xff] }
 0x196   : > { %2364 = vmatprep.subr.bf16.mxu0 %v4175_v44 }
 0x197   : > { %2268 = vmatmul.mubr.bf16.vlgmr.msra.gmra.mrb[4].mxu1 %v4968_v35 }
 0x198   : > { %2354 = vmatmul.mubr.bf16.vlgmr.msra.gmra.mrb[4].mxu0 %v4895_v27  ;;  %v4185_v27 = vld [vmem:[%s4803_s9 + $0x6d0] ss:$24 sps:$4 sm:$0xff]  }
 0x199   : > { %2365 = vmatpush1.bf16.msra.mxu0 %v4173_v45  ;;  %2396 = vmatprep.mubr.bf16.mxu0 %v4926_v56  ;;  %v4188_v56 = vld [vmem:[%s4803_s9 + $0x700] ss:$24 sps:$4 sm:$0xff]  }
 0x19a   : > { %2366 = vmatprep.subr.bf16.mxu0 %v4178_v46  ;;  %v4250_v46 = vld [vmem:[#allocation2 + $0x18] sm:$0xff] }
 0x19d   : > { %2367 = vmatpush1.bf16.msra.mxu0 %v4176_v47 }
 0x19e   : > { %2368 = vmatprep.subr.bf16.mxu0 %v4181_v48 }
 0x1a1   : > { %2369 = vmatpush1.bf16.msra.mxu0 %v4179_v49  ;;  %v4251_v49 = vld [vmem:[#allocation2 + $0x40] sm:$0xff] }
 0x1a2   : > { %2370 = vmatprep.subr.bf16.mxu0 %v4184_v26 }
 0x1a5   : > { %2371 = vmatpush1.bf16.msra.mxu0 %v4182_v1  ;;  %v4252_v1 = vld [vmem:[#allocation2 + $0x48] sm:$0xff] }
 0x1a6   : > { %2372 = vmatprep.subr.bf16.mxu0 %v4187_v50 }
 0x1a9   : > { %2373 = vmatpush1.bf16.msra.mxu0 %v4185_v27 }
 0x1aa   : > { %2374 = vmatprep.subr.bf16.mxu0 %v4190_v51  ;;  %v2054_v53 = vpop.f32.mrb[0].mxu1 }
 0x1ab   : > { %v2056_v2 = vpop.f32.mrb[1].mxu1 }
 0x1ac   : > { %v2058_v55 = vpop.f32.mrb[2].mxu1 }
 0x1ad   : > { %2375 = vmatpush1.bf16.msra.mxu0 %v4188_v56  ;;  %v2060_v58 = vpop.f32.mrb[3].mxu1 }
 0x1ae   : > { %2376 = vmatprep.subr.bf16.mxu0 %v4193_v52 }
 0x1b1   : > { %2377 = vmatpush1.bf16.msra.mxu0 %v4191_v54 }
 0x1b2   : > { %2378 = vmatprep.subr.bf16.mxu0 %v4196_v57  ;;  %v4253_v57 = vld [vmem:[#allocation2 + $0x28] sm:$0xff] }
 0x1b5   : > { %2379 = vmatpush1.bf16.msra.mxu0 %v4194_v59 }
 0x1b6   : > { %2380 = vmatprep.subr.bf16.mxu0 %v4199_v60  ;;  %v4254_v60 = vld [vmem:[#allocation2 + $0x50] sm:$0xff] }
 0x1b9   : > { %2381 = vmatpush1.bf16.msra.mxu0 %v4197_v61 }
 0x1ba   : > { %2382 = vmatprep.subr.bf16.mxu0 %v4202_v62  ;;  %v4255_v62 = vld [vmem:[#allocation2 + $0x58] sm:$0xff] }
 0x1bd   : > { %2383 = vmatpush1.bf16.msra.mxu0 %v4200_v63 }
 0x1be   : > { %2384 = vmatprep.subr.bf16.mxu0 %v4205_v0 }
 0x1c1   : > { %2385 = vmatpush1.bf16.msra.mxu0 %v4203_v3 }
 0x1c2   : > { %2386 = vmatprep.subr.bf16.mxu0 %v4208_v4  ;;  %v4258_v4 = vld [vmem:[#allocation8 + $0x100] ss:$8 sps:$4 sm:$0xff] (!%p3564_p13)  }
 0x1c5   : > { %2387 = vmatpush1.bf16.msra.mxu0 %v4206_v5  ;;  %v4259_v5 = vld [vmem:[#allocation8 + $0x114] ss:$8 sps:$4 sm:$0xff] (!%p3564_p13)  }
 0x1c6   : > { %2388 = vmatprep.subr.bf16.mxu0 %v4211_v6  ;;  %v4261_v6 = vld [vmem:[#allocation8 + $0x110] ss:$8 sps:$4 sm:$0xff] (!%p3564_p13)  }
 0x1c9   : > { %2389 = vmatpush1.bf16.msra.mxu0 %v4209_v7  ;;  %v4262_v7 = vld [vmem:[#allocation8 + $0x124] ss:$8 sps:$4 sm:$0xff] (!%p3564_p13)  }
 0x1ca   : > { %2390 = vmatprep.subr.bf16.mxu0 %v4214_v8  ;;  %v4264_v8 = vld [vmem:[#allocation8 + $0x120] ss:$8 sps:$4 sm:$0xff] (!%p3564_p13)  }
 0x1cd   : > { %2391 = vmatpush1.bf16.msra.mxu0 %v4212_v9  ;;  %v4265_v9 = vld [vmem:[#allocation8 + $0x134] ss:$8 sps:$4 sm:$0xff] (!%p3564_p13)  }
 0x1ce   : > { %2392 = vmatprep.subr.bf16.mxu0 %v4217_v10  ;;  %v4267_v10 = vld [vmem:[#allocation8 + $0x130] ss:$8 sps:$4 sm:$0xff] (!%p3564_p13)  }
 0x1d1   : > { %2393 = vmatpush1.bf16.msra.mxu0 %v4215_v11  ;;  %v4268_v11 = vld [vmem:[#allocation8 + $0x144] ss:$8 sps:$4 sm:$0xff] (!%p3564_p13)  }
 0x1d2   : > { %2394 = vmatprep.subr.bf16.mxu0 %v4220_v12  ;;  %v4270_v12 = vld [vmem:[#allocation8 + $0x140] ss:$8 sps:$4 sm:$0xff] (!%p3564_p13)  }
 0x1d5   : > { %2395 = vmatpush1.bf16.msra.mxu0 %v4218_v13  ;;  %v4271_v13 = vld [vmem:[#allocation8 + $0x154] ss:$8 sps:$4 sm:$0xff] (!%p3564_p13)  }
 0x1d8   : > { %2397 = vmatmul.mubr.bf16.vlgmr.msra.gmra.mrb[4].mxu0 %v4968_v35 }
 0x1eb   : > { %v2140_v14 = vpop.f32.mrb[0].mxu0 }
 0x1ec   : > { %v3665_v15 = vadd.f32 %v2140_v14, %v2054_v53  ;;  %v2142_v16 = vpop.f32.mrb[1].mxu0  ;;  %v4273_v14 = vld [vmem:[#allocation8 + $0x150] ss:$8 sps:$4 sm:$0xff] (!%p3564_p13)  }
 0x1ed   : > { %v3666_v17 = vadd.f32 %v2142_v16, %v2056_v2  ;;  %v2144_v18 = vpop.f32.mrb[2].mxu0  ;;  %v4301_v16 = vld [vmem:[#allocation8 + $0x4] ss:$8 sps:$4 sm:$0xff] (!%p3564_p13)  }
 0x1ee   : > { %4221 = vtanh.f32 %v3665_v15  ;;  %v3667_v19 = vadd.f32 %v2144_v18, %v2058_v55  ;;  %v2146_v20 = vpop.f32.mrb[3].mxu0  ;;  %v4274_v15 = vld [vmem:[#allocation8 + $0x164] ss:$8 sps:$4 sm:$0xff] (!%p3564_p13)   ;;  %v4276_v18 = vld [vmem:[#allocation8 + $0x160] ss:$8 sps:$4 sm:$0xff] (!%p3564_p13)   ;;  %3041 = vmatprep.subr.bf16.mxu1 (!%p3564_p13), %v4301_v16 }
 0x1ef   : > { %4223 = vtanh.f32 %v3666_v17  ;;  %v3668_v21 = vadd.f32 %v2146_v20, %v2060_v58  ;;  %v4303_v17 = vld [vmem:[#allocation8] ss:$8 sps:$4 sm:$0xff] (!%p3564_p13)   ;;  %v4309_v20 = vld [vmem:[#allocation8 + $0x10] ss:$8 sps:$4 sm:$0xff] (!%p3564_p13)   ;;  %v4391_v16 = vld [vmem:[#allocation8 + $0xf4] ss:$8 sps:$4 sm:$0xff] (!%p3564_p13)  }
 0x1f0   : > { %4225 = vtanh.f32 %v3667_v19  ;;  %3042 = vmatpush1.bf16.msra.mxu1 (!%p3564_p13), %v4303_v17  ;;  %v4307_v19 = vld [vmem:[#allocation8 + $0x14] ss:$8 sps:$4 sm:$0xff] (!%p3564_p13)   ;;  %v4334_v17 = vld [vmem:[#allocation8 + $0x240] ss:$8 sps:$4 sm:$0xff] (!%p3564_p13)  }
 0x1f1   : > { %4227 = vtanh.f32 %v3668_v21  ;;  %v4277_v21 = vld [vmem:[#allocation8 + $0x174] ss:$8 sps:$4 sm:$0xff] (!%p3564_p13)   ;;  %3043 = vmatprep.subr.bf16.mxu1 (!%p3564_p13), %v4307_v19 }
 0x1f2   : > { %v4342_v19 = vld [vmem:[#allocation8 + $0x254] ss:$8 sps:$4 sm:$0xff] (!%p3564_p13)  }
 0x1f4   : > { %3044 = vmatpush1.bf16.msra.mxu1 (!%p3564_p13), %v4309_v20 }
 0x1f8   : > { %v4222_v22 = vpop.eup %4221 }
 0x1f9   : > { %v4224_v23 = vpop.eup %4223  ;;  %v5140_v25 = vadd.f32 %v4245_v24, %v4222_v22  ;;  %v4279_v22 = vld [vmem:[#allocation8 + $0x170] ss:$8 sps:$4 sm:$0xff] (!%p3564_p13)   ;;  %v4280_v24 = vld [vmem:[#allocation8 + $0x184] ss:$8 sps:$4 sm:$0xff] (!%p3564_p13)  }
 0x1fa   : > { %v4226_v28 = vpop.eup %4225  ;;  %v5142_v35 = vadd.f32 %v4246_v29, %v4224_v23  ;;  %v4313_v23 = vld [vmem:[#allocation8 + $0x24] ss:$8 sps:$4 sm:$0xff] (!%p3564_p13)   ;;  %v4319_v29 = vld [vmem:[#allocation8 + $0x34] ss:$8 sps:$4 sm:$0xff] (!%p3564_p13)  }
 0x1fb   : > { %v4228_v30 = vpop.eup %4227  ;;  %2431 = vst [vmem:[#allocation2] sm:$0xff] %v5140_v25  ;;  %v5145_v33 = vadd.f32 %v4247_v32, %v4226_v28  ;;  %v4315_v28 = vld [vmem:[#allocation8 + $0x20] ss:$8 sps:$4 sm:$0xff] (!%p3564_p13)   ;;  %3045 = vmatprep.subr.bf16.mxu1 (!%p3564_p13), %v4313_v23  ;;  %v4321_v32 = vld [vmem:[#allocation8 + $0x30] ss:$8 sps:$4 sm:$0xff] (!%p3564_p13)  }
 0x1fc   : > { %2432 = vst [vmem:[#allocation2 + $0x8] sm:$0xff] %v5142_v35  ;;  %v2426_v36 = vadd.f32 %v4248_v34, %v4228_v30  ;;  %v4283_v30 = vld [vmem:[#allocation8 + $0x194] ss:$8 sps:$4 sm:$0xff] (!%p3564_p13)   ;;  %3046 = vmatpush1.bf16.msra.mxu1 (!%p3564_p13), %v4315_v28  ;;  %v4325_v34 = vld [vmem:[#allocation8 + $0x44] ss:$8 sps:$4 sm:$0xff] (!%p3564_p13)  }
 0x1fd   : > { %2437 = vst [vmem:[#allocation2 + $0x30] sm:$0xff] %v5145_v33  ;;  %3047 = vmatprep.subr.bf16.mxu1 (!%p3564_p13), %v4319_v29  ;;  %v2447_v20 = vpack.c.bf16 (!%p3564_p13), %v5145_v33, %v5140_v25  ;;  %v4346_v23 = vld [vmem:[#allocation8 + $0x260] ss:$8 sps:$4 sm:$0xff] (!%p3564_p13)   ;;  %v4352_v28 = vld [vmem:[#allocation8 + $0x270] ss:$8 sps:$4 sm:$0xff] (!%p3564_p13)  }
 0x1fe   : > { %2438 = vst [vmem:[#allocation2 + $0x38] sm:$0xff] %v2426_v36  ;;  %v2448_v3 = vpack.c.bf16 (!%p3564_p13), %v2426_v36, %v5142_v35  ;;  %v4282_v35 = vld [vmem:[#allocation8 + $0x180] ss:$8 sps:$4 sm:$0xff] (!%p3564_p13)   ;;  %v4285_v36 = vld [vmem:[#allocation8 + $0x190] ss:$8 sps:$4 sm:$0xff] (!%p3564_p13)  }
 0x1ff   : > { %v4360_v29 = vld [vmem:[#allocation8 + $0x284] ss:$8 sps:$4 sm:$0xff] (!%p3564_p13)   ;;  %v4364_v25 = vld [vmem:[#allocation8 + $0x290] ss:$8 sps:$4 sm:$0xff] (!%p3564_p13)  }
 0x200   : > { %3073 = vmatprep.mubr.bf16.mxu1 (!%p3564_p13), %v2448_v3  ;;  %3048 = vmatpush1.bf16.msra.mxu1 (!%p3564_p13), %v4321_v32  ;;  %v4372_v33 = vld [vmem:[#allocation8 + $0x2a4] ss:$8 sps:$4 sm:$0xff] (!%p3564_p13)   ;;  %v4370_v32 = vld [vmem:[#allocation8 + $0x2a0] ss:$8 sps:$4 sm:$0xff] (!%p3564_p13)  }
 0x201   : > { %3049 = vmatprep.subr.bf16.mxu1 (!%p3564_p13), %v4325_v34  ;;  %v4378_v34 = vld [vmem:[#allocation8 + $0x2b4] ss:$8 sps:$4 sm:$0xff] (!%p3564_p13)  }
 0x26a   : > { %v2269_v37 = vpop.f32.mrb[4].mxu1 }
 0x26b   : > { %4229 = vtanh.f32 %v2269_v37  ;;  %v2271_v38 = vpop.f32.mrb[5].mxu1  ;;  %v4286_v37 = vld [vmem:[#allocation8 + $0x1a4] ss:$8 sps:$4 sm:$0xff] (!%p3564_p13)  }
 0x26c   : > { %4231 = vtanh.f32 %v2271_v38  ;;  %v2273_v39 = vpop.f32.mrb[6].mxu1  ;;  %v4327_v38 = vld [vmem:[#allocation8 + $0x40] ss:$8 sps:$4 sm:$0xff] (!%p3564_p13)  }
 0x26d   : > { %4233 = vtanh.f32 %v2273_v39  ;;  %v2275_v40 = vpop.f32.mrb[7].mxu1  ;;  %v4331_v39 = vld [vmem:[#allocation8 + $0x54] ss:$8 sps:$4 sm:$0xff] (!%p3564_p13)   ;;  %3050 = vmatpush1.bf16.msra.mxu1 (!%p3564_p13), %v4327_v38  ;;  %v4382_v38 = vld [vmem:[#allocation8 + $0x2c0] ss:$8 sps:$4 sm:$0xff] (!%p3564_p13)  }
 0x26e   : > { %4235 = vtanh.f32 %v2275_v40  ;;  %v4288_v40 = vld [vmem:[#allocation8 + $0x1a0] ss:$8 sps:$4 sm:$0xff] (!%p3564_p13)   ;;  %3051 = vmatprep.subr.bf16.mxu1 (!%p3564_p13), %v4331_v39  ;;  %v4390_v39 = vld [vmem:[#allocation8 + $0x2d4] ss:$8 sps:$4 sm:$0xff] (!%p3564_p13)  }
 0x275   : > { %v4230_v41 = vpop.eup %4229 }
 0x276   : > { %v4232_v42 = vpop.eup %4231  ;;  %v5149_v44 = vadd.f32 %v4249_v43, %v4230_v41  ;;  %v4289_v41 = vld [vmem:[#allocation8 + $0x1b4] ss:$8 sps:$4 sm:$0xff] (!%p3564_p13)   ;;  %v4337_v43 = vld [vmem:[#allocation8 + $0x64] ss:$8 sps:$4 sm:$0xff] (!%p3564_p13)  }
 0x277   : > { %v4234_v45 = vpop.eup %4233  ;;  %v2422_v47 = vadd.f32 %v4250_v46, %v4232_v42  ;;  %v4333_v42 = vld [vmem:[#allocation8 + $0x50] ss:$8 sps:$4 sm:$0xff] (!%p3564_p13)   ;;  %v4292_v46 = vld [vmem:[#allocation8 + $0x1c4] ss:$8 sps:$4 sm:$0xff] (!%p3564_p13)  }
 0x278   : > { %v4236_v48 = vpop.eup %4235  ;;  %2433 = vst [vmem:[#allocation2 + $0x10] sm:$0xff] %v5149_v44  ;;  %v5152_v26 = vadd.f32 %v4251_v49, %v4234_v45  ;;  %v4291_v45 = vld [vmem:[#allocation8 + $0x1b0] ss:$8 sps:$4 sm:$0xff] (!%p3564_p13)   ;;  %3052 = vmatpush1.bf16.msra.mxu1 (!%p3564_p13), %v4333_v42  ;;  %v4294_v49 = vld [vmem:[#allocation8 + $0x1c0] ss:$8 sps:$4 sm:$0xff] (!%p3564_p13)  }
 0x279   : > { %2434 = vst [vmem:[#allocation2 + $0x18] sm:$0xff] %v2422_v47  ;;  %v2428_v50 = vadd.f32 %v4252_v1, %v4236_v48  ;;  %3053 = vmatprep.subr.bf16.mxu1 (!%p3564_p13), %v4337_v43  ;;  %v4343_v48 = vld [vmem:[#allocation8 + $0x74] ss:$8 sps:$4 sm:$0xff] (!%p3564_p13)   ;;  %v4394_v42 = vld [vmem:[#allocation8 + $0x2e0] ss:$8 sps:$4 sm:$0xff] (!%p3564_p13)  }
 0x27a   : > { %2439 = vst [vmem:[#allocation2 + $0x40] sm:$0xff] %v5152_v26  ;;  %v4295_v1 = vld [vmem:[#allocation8 + $0x1d4] ss:$8 sps:$4 sm:$0xff] (!%p3564_p13)   ;;  %v2449_v3 = vpack.c.bf16 (!%p3564_p13), %v5152_v26, %v5149_v44  ;;  %v4322_v26 = vld [vmem:[#allocation8 + $0x220] ss:$8 sps:$4 sm:$0xff] (!%p3564_p13)  }
 0x27b   : > { %2440 = vst [vmem:[#allocation2 + $0x48] sm:$0xff] %v2428_v50  ;;  %v2450_v0 = vpack.c.bf16 (!%p3564_p13), %v2428_v50, %v2422_v47  ;;  %v4339_v47 = vld [vmem:[#allocation8 + $0x60] ss:$8 sps:$4 sm:$0xff] (!%p3564_p13)   ;;  %v4345_v50 = vld [vmem:[#allocation8 + $0x70] ss:$8 sps:$4 sm:$0xff] (!%p3564_p13)  }
 0x27c   : > { %3054 = vmatpush1.bf16.msra.mxu1 (!%p3564_p13), %v4339_v47  ;;  %v4379_v44 = vld [vmem:[#allocation8 + $0xd4] ss:$8 sps:$4 sm:$0xff] (!%p3564_p13)  }
 0x27d   : > { %3116 = vmatprep.mubr.bf16.mxu0 (!%p3564_p13), %v2450_v0  ;;  %3055 = vmatprep.subr.bf16.mxu1 (!%p3564_p13), %v4343_v48  ;;  %v4367_v0 = vld [vmem:[#allocation8 + $0xb4] ss:$8 sps:$4 sm:$0xff] (!%p3564_p13)  }
 0x27e   : > { %v4399_v43 = vld [vmem:[#allocation8 + $0x2f4] ss:$8 sps:$4 sm:$0xff] (!%p3564_p13)  }
 0x280   : > { %3056 = vmatpush1.bf16.msra.mxu1 (!%p3564_p13), %v4345_v50  ;;  %v2551_v50 = vlaneseq (!%p3564_p13) }
 0x2ab   : > { %v2398_v27 = vpop.f32.mrb[4].mxu0 }
 0x2ac   : > { %4237 = vtanh.f32 %v2398_v27  ;;  %v2400_v51 = vpop.f32.mrb[5].mxu0  ;;  %v4349_v27 = vld [vmem:[#allocation8 + $0x84] ss:$8 sps:$4 sm:$0xff] (!%p3564_p13)  }
 0x2ad   : > { %4239 = vtanh.f32 %v2400_v51  ;;  %v2402_v56 = vpop.f32.mrb[6].mxu0  ;;  %v4297_v51 = vld [vmem:[#allocation8 + $0x1d0] ss:$8 sps:$4 sm:$0xff] (!%p3564_p13)   ;;  %3057 = vmatprep.subr.bf16.mxu1 (!%p3564_p13), %v4349_v27  ;;  %v2552_v27 = vshrl.u32 (!%p3564_p13), %v2551_v50, 7 }
 0x2ae   : > { %4241 = vtanh.f32 %v2402_v56  ;;  %v2404_v52 = vpop.f32.mrb[7].mxu0  ;;  %v4298_v56 = vld [vmem:[#allocation8 + $0x1e4] ss:$8 sps:$4 sm:$0xff] (!%p3564_p13)  }
 0x2af   : > { %4243 = vtanh.f32 %v2404_v52  ;;  %v4351_v52 = vld [vmem:[#allocation8 + $0x80] ss:$8 sps:$4 sm:$0xff] (!%p3564_p13)  }
 0x2b0   : > { %3058 = vmatpush1.bf16.msra.mxu1 (!%p3564_p13), %v4351_v52  ;;  %v2557_v52 = vsub.s32 (!%p3564_p13), 1, %v2552_v27 }
 0x2b6   : > { %v4238_v53 = vpop.eup %4237  ;;  %2446 = sbr.rel (%p3564_p13) target bundleno = 1042 (0x412), region = 60 }
 0x2b7   : > { %v4240_v2 = vpop.eup %4239  ;;  %v5156_v54 = vadd.f32 %v4238_v53, %v4963_v31  ;;  %v4256_v31 = vld [vmem:[#allocation8 + $0x104] ss:$8 sps:$4 sm:$0xff] (!%p3564_p13)   ;;  %v4355_v53 = vld [vmem:[#allocation8 + $0x94] ss:$8 sps:$4 sm:$0xff] (!%p3564_p13)  }
 0x2b8   : > { %v4242_v55 = vpop.eup %4241  ;;  %v5158_v58 = vadd.f32 %v4253_v57, %v4240_v2  ;;  %3084 = vmatprep.subr.bf16.mxu0 (!%p3564_p13), %v4256_v31  ;;  %v4300_v2 = vld [vmem:[#allocation8 + $0x1e0] ss:$8 sps:$4 sm:$0xff] (!%p3564_p13)   ;;  %v4357_v57 = vld [vmem:[#allocation8 + $0x90] ss:$8 sps:$4 sm:$0xff] (!%p3564_p13)   ;;  %3059 = vmatprep.subr.bf16.mxu1 (!%p3564_p13), %v4355_v53 }
 0x2b9   : > { %v4244_v59 = vpop.eup %4243  ;;  %2435 = vst [vmem:[#allocation2 + $0x20] sm:$0xff] %v5156_v54  ;;  %v5161_v61 = vadd.f32 %v4254_v60, %v4242_v55  ;;  %3085 = vmatpush1.bf16.msra.mxu0 (!%p3564_p13), %v4258_v4  ;;  %v4304_v55 = vld [vmem:[#allocation8 + $0x1f4] ss:$8 sps:$4 sm:$0xff] (!%p3564_p13)   ;;  %v4306_v60 = vld [vmem:[#allocation8 + $0x1f0] ss:$8 sps:$4 sm:$0xff] (!%p3564_p13)   ;;  %3060 = vmatpush1.bf16.msra.mxu1 (!%p3564_p13), %v4357_v57 }
 0x2ba   : > { %2436 = vst [vmem:[#allocation2 + $0x28] sm:$0xff] %v5158_v58  ;;  %v5164_v63 = vadd.f32 %v4255_v62, %v4244_v59  ;;  %3086 = vmatprep.subr.bf16.mxu0 (!%p3564_p13), %v4259_v5  ;;  %v4361_v59 = vld [vmem:[#allocation8 + $0xa4] ss:$8 sps:$4 sm:$0xff] (!%p3564_p13)   ;;  %v4363_v31 = vld [vmem:[#allocation8 + $0xa0] ss:$8 sps:$4 sm:$0xff] (!%p3564_p13)  }
 0x2bb   : > { %2441 = vst [vmem:[#allocation2 + $0x50] sm:$0xff] %v5161_v61  ;;  %v4312_v62 = vld [vmem:[#allocation8 + $0x204] ss:$8 sps:$4 sm:$0xff] (!%p3564_p13)   ;;  %3061 = vmatprep.subr.bf16.mxu1 (!%p3564_p13), %v4361_v59  ;;  %v4310_v4 = vld [vmem:[#allocation8 + $0x200] ss:$8 sps:$4 sm:$0xff] (!%p3564_p13)  }
 0x2bc   : > { %2442 = vst [vmem:[#allocation2 + $0x58] sm:$0xff] %v5164_v63  ;;  %v4369_v5 = vld [vmem:[#allocation8 + $0xb0] ss:$8 sps:$4 sm:$0xff] (!%p3564_p13)  }
 0x2bd   : > { %3087 = vmatpush1.bf16.msra.mxu0 %v4261_v6  ;;  %3062 = vmatpush1.bf16.msra.mxu1 %v4363_v31  ;;  %v4318_v6 = vld [vmem:[#allocation8 + $0x214] ss:$8 sps:$4 sm:$0xff]  }
 0x2be   : > { %3088 = vmatprep.subr.bf16.mxu0 %v4262_v7  ;;  %3063 = vmatprep.subr.bf16.mxu1 %v4367_v0  ;;  %v4373_v7 = vld [vmem:[#allocation8 + $0xc4] ss:$8 sps:$4 sm:$0xff]  }
 0x2c1   : > { %3089 = vmatpush1.bf16.msra.mxu0 %v4264_v8  ;;  %v2452_v8 = vpack.c.bf16 %v5164_v63, %v5158_v58  ;;  %3064 = vmatpush1.bf16.msra.mxu1 %v4369_v5  ;;  %v4328_v58 = vld [vmem:[#allocation8 + $0x230] ss:$8 sps:$4 sm:$0xff]   ;;  %v4387_v63 = vld [vmem:[#allocation8 + $0xe0] ss:$8 sps:$4 sm:$0xff]  }
 0x2c2   : > { %3090 = vmatprep.subr.bf16.mxu0 %v4265_v9  ;;  %v4316_v9 = vld [vmem:[#allocation8 + $0x210] ss:$8 sps:$4 sm:$0xff]   ;;  %3065 = vmatprep.subr.bf16.mxu1 %v4373_v7 }
 0x2c5   : > { %3091 = vmatpush1.bf16.msra.mxu0 %v4267_v10  ;;  %v4375_v10 = vld [vmem:[#allocation8 + $0xc0] ss:$8 sps:$4 sm:$0xff]  }
 0x2c6   : > { %3092 = vmatprep.subr.bf16.mxu0 %v4268_v11  ;;  %v4324_v11 = vld [vmem:[#allocation8 + $0x224] ss:$8 sps:$4 sm:$0xff]   ;;  %3066 = vmatpush1.bf16.msra.mxu1 %v4375_v10 }
 0x2c7   : > { %3067 = vmatprep.subr.bf16.mxu1 %v4379_v44 }
 0x2c9   : > { %3093 = vmatpush1.bf16.msra.mxu0 %v4270_v12  ;;  %v4381_v12 = vld [vmem:[#allocation8 + $0xd0] ss:$8 sps:$4 sm:$0xff]  }
 0x2ca   : > { %3094 = vmatprep.subr.bf16.mxu0 %v4271_v13  ;;  %v4330_v13 = vld [vmem:[#allocation8 + $0x234] ss:$8 sps:$4 sm:$0xff]   ;;  %3068 = vmatpush1.bf16.msra.mxu1 %v4381_v12 }
 0x2cd   : > { %3095 = vmatpush1.bf16.msra.mxu0 %v4273_v14  ;;  %v4385_v14 = vld [vmem:[#allocation8 + $0xe4] ss:$8 sps:$4 sm:$0xff]  }
 0x2ce   : > { %3096 = vmatprep.subr.bf16.mxu0 %v4274_v15  ;;  %v4336_v15 = vld [vmem:[#allocation8 + $0x244] ss:$8 sps:$4 sm:$0xff]   ;;  %3069 = vmatprep.subr.bf16.mxu1 %v4385_v14 }
 0x2cf   : > { %3070 = vmatpush1.bf16.msra.mxu1 %v4387_v63 }
 0x2d0   : > { %3071 = vmatprep.subr.bf16.mxu1 %v4391_v16 }
 0x2d1   : > { %3097 = vmatpush1.bf16.msra.mxu0 %v4276_v18  ;;  %v4393_v18 = vld [vmem:[#allocation8 + $0xf0] ss:$8 sps:$4 sm:$0xff]  }
 0x2d2   : > { %3098 = vmatprep.subr.bf16.mxu0 %v4277_v21  ;;  %v4340_v21 = vld [vmem:[#allocation8 + $0x250] ss:$8 sps:$4 sm:$0xff]  }
 0x2d3   : > { %3072 = vmatpush1.bf16.msra.mxu1 %v4393_v18 }
 0x2d5   : > { %3099 = vmatpush1.bf16.msra.mxu0 %v4279_v22  ;;  %v4348_v22 = vld [vmem:[#allocation8 + $0x264] ss:$8 sps:$4 sm:$0xff]  }
 0x2d6   : > { %3100 = vmatprep.subr.bf16.mxu0 %v4280_v24  ;;  %3074 = vmatmul.mubr.bf16.vlgmr.msra.gmra.mrb[0].mxu1 %v2447_v20  ;;  %v4354_v24 = vld [vmem:[#allocation8 + $0x274] ss:$8 sps:$4 sm:$0xff]  }
 0x2d9   : > { %3101 = vmatpush1.bf16.msra.mxu0 %v4282_v35  ;;  %v4358_v35 = vld [vmem:[#allocation8 + $0x280] ss:$8 sps:$4 sm:$0xff]  }
 0x2da   : > { %3102 = vmatprep.subr.bf16.mxu0 %v4283_v30  ;;  %v4366_v30 = vld [vmem:[#allocation8 + $0x294] ss:$8 sps:$4 sm:$0xff]  }
 0x2dd   : > { %3103 = vmatpush1.bf16.msra.mxu0 %v4285_v36  ;;  %v4376_v36 = vld [vmem:[#allocation8 + $0x2b0] ss:$8 sps:$4 sm:$0xff]  }
 0x2de   : > { %3104 = vmatprep.subr.bf16.mxu0 %v4286_v37  ;;  %v4384_v37 = vld [vmem:[#allocation8 + $0x2c4] ss:$8 sps:$4 sm:$0xff]  }
 0x2e1   : > { %3105 = vmatpush1.bf16.msra.mxu0 %v4288_v40  ;;  %v4388_v40 = vld [vmem:[#allocation8 + $0x2d0] ss:$8 sps:$4 sm:$0xff]  }
 0x2e2   : > { %3106 = vmatprep.subr.bf16.mxu0 %v4289_v41  ;;  %v4396_v41 = vld [vmem:[#allocation8 + $0x2e4] ss:$8 sps:$4 sm:$0xff]  }
 0x2e5   : > { %3107 = vmatpush1.bf16.msra.mxu0 %v4291_v45  ;;  %v4397_v45 = vld [vmem:[#allocation8 + $0x2f0] ss:$8 sps:$4 sm:$0xff]  }
 0x2e6   : > { %3108 = vmatprep.subr.bf16.mxu0 %v4292_v46  ;;  %v2451_v46 = vpack.c.bf16 %v5161_v61, %v5156_v54 }
 0x2e9   : > { %3109 = vmatpush1.bf16.msra.mxu0 %v4294_v49 }
 0x2ea   : > { %3110 = vmatprep.subr.bf16.mxu0 %v4295_v1 }
 0x2ed   : > { %3111 = vmatpush1.bf16.msra.mxu0 %v4297_v51  ;;  %v2553_v51 = vsub.s32 0, %v2552_v27 }
 0x2ee   : > { %3112 = vmatprep.subr.bf16.mxu0 %v4298_v56  ;;  %v2549_v56 = vld [vmem:[#allocation9] sm:$0x3] }
 0x2ef   : > { %v2554_v53 = vrot.slane %v2549_v56, %v2553_v51 }
 0x2f1   : > { %3113 = vmatpush1.bf16.msra.mxu0 %v4300_v2  ;;  %v2558_v2 = vrot.slane %v2549_v56, %v2557_v52 }
 0x2f2   : > { %3114 = vmatprep.subr.bf16.mxu0 %v4304_v55 }
 0x2f5   : > { %3115 = vmatpush1.bf16.msra.mxu0 %v4306_v60 }
 0x2f6   : > { %3127 = vmatprep.subr.bf16.mxu0 %v4312_v62 }
 0x2f8   : > { %3117 = vmatmul.mubr.bf16.vlgmr.msra.gmra.mrb[0].mxu0 %v2449_v3 }
 0x2f9   : > { %3128 = vmatpush1.bf16.msra.mxu0 %v4310_v4  ;;  %3159 = vmatprep.mubr.bf16.mxu0 %v2452_v8 }
 0x2fa   : > { %3129 = vmatprep.subr.bf16.mxu0 %v4318_v6 }
 0x2fd   : > { %3130 = vmatpush1.bf16.msra.mxu0 %v4316_v9 }
 0x2fe   : > { %3131 = vmatprep.subr.bf16.mxu0 %v4324_v11 }
 0x301   : > { %3132 = vmatpush1.bf16.msra.mxu0 %v4322_v26 }
 0x302   : > { %3133 = vmatprep.subr.bf16.mxu0 %v4330_v13 }
 0x305   : > { %3134 = vmatpush1.bf16.msra.mxu0 %v4328_v58 }
 0x306   : > { %3135 = vmatprep.subr.bf16.mxu0 %v4336_v15 }
 0x309   : > { %3136 = vmatpush1.bf16.msra.mxu0 %v4334_v17 }
 0x30a   : > { %3137 = vmatprep.subr.bf16.mxu0 %v4342_v19 }
 0x30d   : > { %3138 = vmatpush1.bf16.msra.mxu0 %v4340_v21 }
 0x30e   : > { %3139 = vmatprep.subr.bf16.mxu0 %v4348_v22 }
 0x311   : > { %3140 = vmatpush1.bf16.msra.mxu0 %v4346_v23 }
 0x312   : > { %3141 = vmatprep.subr.bf16.mxu0 %v4354_v24 }
 0x315   : > { %3142 = vmatpush1.bf16.msra.mxu0 %v4352_v28 }
 0x316   : > { %3143 = vmatprep.subr.bf16.mxu0 %v4360_v29 }
 0x319   : > { %3144 = vmatpush1.bf16.msra.mxu0 %v4358_v35 }
 0x31a   : > { %3145 = vmatprep.subr.bf16.mxu0 %v4366_v30 }
 0x31d   : > { %3146 = vmatpush1.bf16.msra.mxu0 %v4364_v25 }
 0x31e   : > { %3147 = vmatprep.subr.bf16.mxu0 %v4372_v33 }
 0x321   : > { %3148 = vmatpush1.bf16.msra.mxu0 %v4370_v32 }
 0x322   : > { %3149 = vmatprep.subr.bf16.mxu0 %v4378_v34 }
 0x325   : > { %3150 = vmatpush1.bf16.msra.mxu0 %v4376_v36 }
 0x326   : > { %3151 = vmatprep.subr.bf16.mxu0 %v4384_v37 }
 0x329   : > { %3152 = vmatpush1.bf16.msra.mxu0 %v4382_v38 }
 0x32a   : > { %3153 = vmatprep.subr.bf16.mxu0 %v4390_v39 }
 0x32d   : > { %3154 = vmatpush1.bf16.msra.mxu0 %v4388_v40 }
 0x32e   : > { %3155 = vmatprep.subr.bf16.mxu0 %v4396_v41 }
 0x331   : > { %3156 = vmatpush1.bf16.msra.mxu0 %v4394_v42 }
 0x332   : > { %3157 = vmatprep.subr.bf16.mxu0 %v4399_v43 }
 0x335   : > { %3158 = vmatpush1.bf16.msra.mxu0 %v4397_v45 }
 0x338   : > { %3160 = vmatmul.mubr.bf16.vlgmr.msra.gmra.mrb[0].mxu0 %v2451_v46 }
 0x3a9   : > { %v3075_v47 = vpop.f32.mrb[0].mxu1 }
 0x3aa   : > { %v3077_v48 = vpop.f32.mrb[1].mxu1  ;;  %v3076_v55 = vadd.f32 %v3075_v47, %v2554_v53 }
 0x3ab   : > { %v3079_v49 = vpop.f32.mrb[2].mxu1  ;;  %v3078_v57 = vadd.f32 %v3077_v48, %v2558_v2 }
 0x3ac   : > { %v3081_v1 = vpop.f32.mrb[3].mxu1  ;;  %v3080_v60 = vadd.f32 %v3079_v49, %v2554_v53 }
 0x3ad   : > { %v3082_v54 = vadd.f32 %v3081_v1, %v2558_v2 }
 0x40b   : > { %v3161_v59 = vpop.f32.mrb[0].mxu0 }
 0x40c   : > { %v3690_v62 = vadd.f32 %v3161_v59, %v3076_v55  ;;  %v3163_v31 = vpop.f32.mrb[1].mxu0 }
 0x40d   : > { %v3692_v61 = vadd.f32 %v3163_v31, %v3078_v57  ;;  %v3165_v0 = vpop.f32.mrb[2].mxu0 }
 0x40e   : > { %3170 = vst [vmem:[#allocation11] sm:$0xff] %v3690_v62  ;;  %v3694_v3 = vadd.f32 %v3165_v0, %v3080_v60  ;;  %v3167_v4 = vpop.f32.mrb[3].mxu0 }
 0x40f   : > { %3171 = vst [vmem:[#allocation11 + $0x8] sm:$0xff] %v3692_v61  ;;  %v3696_v5 = vadd.f32 %v3167_v4, %v3082_v54 }
 0x410   : > { %3172 = vst [vmem:[#allocation11 + $0x10] sm:$0xff] %v3694_v3 }
 0x411   : > { %3173 = vst [vmem:[#allocation11 + $0x18] sm:$0xff] %v3696_v5 }
 0x412 PF: > { %p3743_p2 = scmp.eq.s32.totalorder %s4649_s19, 1  ;;  %s4602_s25 = smov [#allocation11]  }
 0x413   : > { %s3180_s26 = sshll.u32 %s4602_s25, 4  ;;  %s3181_s26 = int_to_ptr.vmem [resolvable:$true] %s3180_s26 }
 0x414   : > { %s4514_s30 = scalar_lea.vmem %s3181_s26, 512  ;;  %p4521_p5 = scmp.lt.s32.totalorder %s3181_s26, %s3181_s26 }
 0x415   : > { %p4515_p8 = scmp.ne.s32.totalorder %s3181_s26, %s4514_s30  ;;  %p4522_p9 = scmp.lt.s32.totalorder %s4514_s30, %s4514_s30 }
 0x417   : > { %p4516_p10 = pnand %p4515_p8, %p3743_p2  ;;  %p4523_p1 = por %p4522_p9, %p4521_p5 }
 0x419   : > { %p4517_p0 = pneg %p4516_p10 }
 0x41b   : > { %p4524_p3 = pnand %p4523_p1, %p4517_p0 }
 0x41d   : > { %4527 = shalt.err (!%p4524_p3)
}
 0x41e   : > { %s4528_s8 = scalar_lea.hbm %s5218_s4, 512 }
 0x41f   : > { %p4529_p12 = scmp.ne.s32.totalorder %s5218_s4, %s4528_s8  ;;  %p4534_p7 = scmp.lt.u32.totalorder %s4528_s8, %s5218_s4 }
 0x421   : > { %p4530_p4 = pnand %p4529_p12, %p3743_p2 }
 0x423   : > { %p4531_p6 = pneg %p4530_p4 }
 0x425   : > { %p4536_p11 = pnand %p4534_p7, %p4531_p6 }
 0x427   : > { %4539 = shalt.err (!%p4536_p11)
}
 0x428   : > { %s4603_s12 = smov 256   ;;  %s4604_s5 = smov 16  }
 0x429   : > { %3719 = dma.vmem_to_hbm [thread:$0]  (%p3743_p2), %s3181_s26, 512, %s5218_s4, [#allocation5], %s4603_s12, %s4603_s12, %s4604_s5  }
 0x42a   : > { %4573 = dma.done.wait (%p3743_p2), [#allocation5], 512  }
 0x42b   : > { %4575 = vsyncadd (%p3743_p2), [#allocation5], 4294966784 }
 0x42c PF: > { %p17_p13 = scmp.ge.s32.totalorder %s4652_s20, 4   ;;  %s5241_s15 = smov %s4582_s16 }
 0x42d   : > { %s5242_s16 = smov %s4586_s17  ;;  %s5243_s17 = smov %s4662_s23 }
 0x42e   : > { %s5244_s18 = smov %s4652_s20  ;;  %19 = sbr.rel (!%p17_p13) target bundleno = 8 (0x8), region = 94 }
 0x435   :  { %3196 = vsyncpa [#allocation4], 1 }
 0x436   :  { %3198 = vsyncpa [#allocation4 + $0x1], 1 }
 0x437   :  { %3199 = vsyncpa [#allocation7], 1 }
 0x438   :  { %3201 = vsyncpa [#allocation7 + $0x1], 1 }
 0x439   :  { %3202 = vsyncpa [#allocation10], 1 }
 0x43a   :  { %3203 = vsyncpa [#allocation5], 1 }
 0x43b   :  { %3205 = vsyncpa [#allocation5 + $0x1], 1 }

</bundles_post_ra>
